<compile_context>
chip_gen: v7x
topology: tpu7x:2x2x1
jax: 0.10.0
libtpu: 0.0.40
codegen_flags: <defaults>
</compile_context>

<pallas_src>
import functools

import jax
import jax.numpy as jnp
from jax import lax
from jax.experimental import pallas as pl
from jax.experimental.pallas import tpu as pltpu

C = 512            # BatchNorm2d(num_features=512)
POOL = 7           # AdaptiveMaxPool2d((7, 7))
HW = POOL * POOL   # 49 pooled spatial positions
FEAT = HW * C      # 25088 = fc in_features
NUM_CLASSES = 2    # fc out_features
BN_EPS = 1e-5      # PyTorch BatchNorm2d default eps
NB_MAX = 32        # max batch rows per grid step
X_BUF_BUDGET = 8 << 20   # per-buffer VMEM budget for the window slab (bytes)


def _round_up(v, m):
    return (v + m - 1) // m * m


def _gender_kernel(x_ref, w_ref, b_ref, o_ref, acc_ref, *, kc, n_kchunks):
    """One (batch tile, kk chunk) per grid step.

    x_ref:   (kc, NB, FEAT) bf16   pool-window axis leading, (h, c)-minor flattened features
    w_ref:   (2, FEAT)      bf16   BN-folded fc weight, lane-dense
    b_ref:   (1, 2)         f32    BN-folded fc bias
    o_ref:   (NB, 2)        f32
    acc_ref: (NB, FEAT)     bf16   running-max scratch (used only when n_kchunks > 1)
    """
    # Max over this chunk's window slabs: pure elementwise VPU maxes (exact in bf16).
    m = x_ref[0]
    for i in range(1, kc):
        m = jnp.maximum(m, x_ref[i])

    def finalize(pooled):
        # Linear(25088 -> 2), BN already folded in: bf16 x bf16 MXU, f32 accumulation.
        logits = lax.dot_general(
            pooled, w_ref[...],
            dimension_numbers=(((1,), (1,)), ((), ())),
            preferred_element_type=jnp.float32)
        o_ref[...] = logits + b_ref[...]

    if n_kchunks == 1:
        finalize(m)
    else:
        k = pl.program_id(1)

        @pl.when(k == 0)
        def _():
            acc_ref[...] = m

        @pl.when(k != 0)
        def _():
            acc_ref[...] = jnp.maximum(acc_ref[...], m)

        @pl.when(k == n_kchunks - 1)
        def _():
            finalize(acc_ref[...])


def gender_feature_extractor(x_nchw, fc_w, fc_b, gamma, beta, run_mean, run_var):
    N, Cin, H, W = x_nchw.shape
    assert Cin == C and H % POOL == 0 and W % POOL == 0, \
        "adaptive max pool implemented for H, W multiples of 7 (uniform windows)"
    kh, kw = H // POOL, W // POOL
    kk = kh * kw

    # ---- batch tiling: no padding for small batches (full-dim block is legal) ----
    if N <= NB_MAX:
        nb, n_pad = N, N
    else:
        nb = NB_MAX
        n_pad = _round_up(N, nb)
    n_blocks = n_pad // nb
    if n_pad != N:
        x_nchw = jnp.pad(x_nchw, ((0, n_pad - N), (0, 0), (0, 0), (0, 0)))

    # ---- kk chunking so the window slab stays within the per-buffer VMEM budget ----
    nb_vmem = _round_up(nb, 16)                       # bf16 sublane tile padding in VMEM
    kc = 1
    for d in range(kk, 0, -1):
        if kk % d == 0 and d * nb_vmem * FEAT * 2 <= X_BUF_BUDGET:
            kc = d
            break
    n_kchunks = kk // kc

    # ---- window-major relayout, emitted in bf16 (layout plumbing, no compute) ----
    # (N, C, 7, kh, 7, kw) -> (kh, kw, N, 7, 7, C) -> (kk, N, 49*C);  f = (ph*7+pw)*C + c
    xw = (x_nchw.astype(jnp.bfloat16)
          .reshape(n_pad, C, POOL, kh, POOL, kw)
          .transpose(3, 5, 0, 2, 4, 1)
          .reshape(kk, n_pad, FEAT))

    # ---- fold eval-mode BatchNorm into fc weight and bias ----
    scale = gamma / jnp.sqrt(run_var + BN_EPS)                     # (C,)
    shift = beta - run_mean * scale                                # (C,)
    w3 = fc_w.reshape(NUM_CLASSES, C, HW)                          # PyTorch (o, c, s) order
    w_k = ((w3 * scale[None, :, None])                             # scale per channel
           .transpose(0, 2, 1)                                     # -> (o, s, c): f = s*C + c
           .reshape(NUM_CLASSES, FEAT)
           .astype(jnp.bfloat16))                                  # (2, FEAT), lane-dense
    b_k = (fc_b + (w3 * shift[None, :, None]).sum(axis=(1, 2)))    # shift folded into bias
    b_k = b_k.reshape(1, NUM_CLASSES).astype(jnp.float32)

    # ---- explicit VMEM budget (blocks + scratch + margin) ----
    x_buf = kc * nb_vmem * FEAT * 2
    acc_buf = nb_vmem * FEAT * 2
    w_buf = 16 * FEAT * 2
    misc = (8 * 128 * 4) * 2 + _round_up(nb, 8) * 128 * 4 * 2
    vmem_bytes = int(2 * x_buf + acc_buf + w_buf + misc + (4 << 20))

    out = pl.pallas_call(
        functools.partial(_gender_kernel, kc=kc, n_kchunks=n_kchunks),
        out_shape=jax.ShapeDtypeStruct((n_pad, NUM_CLASSES), jnp.float32),
        grid_spec=pltpu.PrefetchScalarGridSpec(
            num_scalar_prefetch=0,
            grid=(n_blocks, n_kchunks),
            in_specs=[
                pl.BlockSpec((kc, nb, FEAT), lambda b, k: (k, b, 0)),
                pl.BlockSpec((NUM_CLASSES, FEAT), lambda b, k: (0, 0),
                             pipeline_mode=pl.Buffered(1)),
                pl.BlockSpec((1, NUM_CLASSES), lambda b, k: (0, 0),
                             pipeline_mode=pl.Buffered(1)),
            ],
            out_specs=pl.BlockSpec((nb, NUM_CLASSES), lambda b, k: (b, 0)),
            scratch_shapes=[pltpu.VMEM((nb, FEAT), jnp.bfloat16)],
        ),
        compiler_params=pltpu.CompilerParams(
            dimension_semantics=("parallel", "arbitrary"),
            vmem_limit_bytes=vmem_bytes),
    )(xw, w_k, b_k)
    return out[:N]


def reference(x_nchw, fc_w, fc_b, gamma, beta, run_mean, run_var):
    """Pure-JAX f32 reference mirroring the PyTorch forward (eval-mode BN)."""
    N, Cin, H, W = x_nchw.shape
    pooled = x_nchw.reshape(N, Cin, POOL, H // POOL, POOL, W // POOL).max(axis=(3, 5))
    scale = gamma / jnp.sqrt(run_var + BN_EPS)
    shift = beta - run_mean * scale
    y = pooled * scale[None, :, None, None] + shift[None, :, None, None]
    flat = y.reshape(N, Cin * POOL * POOL)          # C-major flatten, like x.view(-1, 512*7*7)
    return flat @ fc_w.T + fc_b


if __name__ == "__main__":
    key = jax.random.PRNGKey(0)
    ks = jax.random.split(key, 7)

    N, H, W = 2, 14, 14                              # (N, 512, 14, 14) NCHW input
    x = jax.random.normal(ks[0], (N, C, H, W), jnp.float32)

    # Deterministic synthetic parameters (shapes from the module's __init__).
    fc_w = jax.random.normal(ks[1], (NUM_CLASSES, FEAT), jnp.float32) * 0.01
    fc_b = jax.random.normal(ks[2], (NUM_CLASSES,), jnp.float32) * 0.01
    gamma = jax.random.uniform(ks[3], (C,), jnp.float32, 0.5, 1.5)       # bn.weight
    beta = jax.random.normal(ks[4], (C,), jnp.float32) * 0.1             # bn.bias
    run_mean = jax.random.normal(ks[5], (C,), jnp.float32) * 0.1         # bn.running_mean
    run_var = jax.random.uniform(ks[6], (C,), jnp.float32, 0.5, 1.5)     # bn.running_var

    out = jax.block_until_ready(
        gender_feature_extractor(x, fc_w, fc_b, gamma, beta, run_mean, run_var))
    ref = reference(x, fc_w, fc_b, gamma, beta, run_mean, run_var)

    assert out.shape == (N, NUM_CLASSES), out.shape
    # bf16 activations/weights (f32 accumulation) over K=25088 -> loosened tolerance.
    assert jnp.allclose(out, ref, rtol=2e-2, atol=2e-2), (out, ref)
    print("KERNEL_OK")
</pallas_src>

<mosaic_0001>
module attributes {stable_mosaic.version = 11 : i64} {
  func.func @_gender_kernel(%arg0: i32, %arg1: i32, %arg2: memref<4x2x25088xbf16, #tpu.memory_space<vmem>>, %arg3: memref<2x25088xbf16, #tpu.memory_space<vmem>>, %arg4: memref<1x2xf32, #tpu.memory_space<vmem>>, %arg5: memref<2x2xf32, #tpu.memory_space<vmem>>, %arg6: memref<2x25088xbf16, #tpu.memory_space<vmem>>) attributes {dimension_semantics = [#tpu.dimension_semantics<parallel>, #tpu.dimension_semantics<arbitrary>], iteration_bounds = array<i64: 1, 1>, scalar_prefetch = 0 : i64, scratch_operands = 1 : i64, tpu.core_type = #tpu.core_type<tc>, window_params = [{transform_indices = @transform_0, window_bounds = array<i64: 4, 2, 25088>}, {pipeline_mode = #tpu.pipeline_mode<synchronous>, transform_indices = @transform_1, window_bounds = array<i64: 2, 25088>}, {pipeline_mode = #tpu.pipeline_mode<synchronous>, transform_indices = @transform_2, window_bounds = array<i64: 1, 2>}, {transform_indices = @transform_3, window_bounds = array<i64: 2, 2>}]} {
    %c0 = arith.constant 0 : index
    %c0_0 = arith.constant 0 : index
    %c0_1 = arith.constant 0 : index
    %0 = vector.load %arg2[%c0, %c0_0, %c0_1] : memref<4x2x25088xbf16, #tpu.memory_space<vmem>>, vector<1x2x25088xbf16>
    %1 = vector.shape_cast %0 : vector<1x2x25088xbf16> to vector<2x25088xbf16>
    %c1 = arith.constant 1 : index
    %c0_2 = arith.constant 0 : index
    %c0_3 = arith.constant 0 : index
    %2 = vector.load %arg2[%c1, %c0_2, %c0_3] : memref<4x2x25088xbf16, #tpu.memory_space<vmem>>, vector<1x2x25088xbf16>
    %3 = vector.shape_cast %2 : vector<1x2x25088xbf16> to vector<2x25088xbf16>
    %4 = arith.maximumf %1, %3 : vector<2x25088xbf16>
    %c2 = arith.constant 2 : index
    %c0_4 = arith.constant 0 : index
    %c0_5 = arith.constant 0 : index
    %5 = vector.load %arg2[%c2, %c0_4, %c0_5] : memref<4x2x25088xbf16, #tpu.memory_space<vmem>>, vector<1x2x25088xbf16>
    %6 = vector.shape_cast %5 : vector<1x2x25088xbf16> to vector<2x25088xbf16>
    %7 = arith.maximumf %4, %6 : vector<2x25088xbf16>
    %c3 = arith.constant 3 : index
    %c0_6 = arith.constant 0 : index
    %c0_7 = arith.constant 0 : index
    %8 = vector.load %arg2[%c3, %c0_6, %c0_7] : memref<4x2x25088xbf16, #tpu.memory_space<vmem>>, vector<1x2x25088xbf16>
    %9 = vector.shape_cast %8 : vector<1x2x25088xbf16> to vector<2x25088xbf16>
    %10 = arith.maximumf %7, %9 : vector<2x25088xbf16>
    %c0_8 = arith.constant 0 : index
    %c0_9 = arith.constant 0 : index
    %11 = vector.load %arg3[%c0_8, %c0_9] : memref<2x25088xbf16, #tpu.memory_space<vmem>>, vector<2x25088xbf16>
    %cst = arith.constant dense<0.000000e+00> : vector<2x2xf32>
    %12 = tpu.matmul %10, %11, %cst {dimension_numbers = #tpu.dot_dimension_numbers<[1], [1], [0], [0], [0, 0, 1, 0], [], []>} : vector<2x25088xbf16>, vector<2x25088xbf16>, vector<2x2xf32> -> vector<2x2xf32>
    %c0_10 = arith.constant 0 : index
    %c0_11 = arith.constant 0 : index
    %13 = vector.load %arg4[%c0_10, %c0_11] : memref<1x2xf32, #tpu.memory_space<vmem>>, vector<1x2xf32>
    %14 = vector.broadcast %13 : vector<1x2xf32> to vector<2x2xf32>
    %15 = arith.addf %12, %14 : vector<2x2xf32>
    %c0_12 = arith.constant 0 : index
    %c0_13 = arith.constant 0 : index
    %16 = vector.load %arg5[%c0_12, %c0_13] : memref<2x2xf32, #tpu.memory_space<vmem>>, vector<2x2xf32>
    tpu.vector_store %arg5[%c0_12, %c0_13], %15 {strides = array<i32>} : memref<2x2xf32, #tpu.memory_space<vmem>>, vector<2x2xf32>,
    return
  }
  func.func @transform_0(%arg0: i32, %arg1: i32) -> (i32, i32, i32) {
    %c0_i32 = arith.constant 0 : i32
    %c0_i32_0 = arith.constant 0 : i32
    return %arg1, %arg0, %c0_i32 : i32, i32, i32
  }
  func.func @transform_1(%arg0: i32, %arg1: i32) -> (i32, i32) {
    %c0_i32 = arith.constant 0 : i32
    %c0_i32_0 = arith.constant 0 : i32
    %c0_i32_1 = arith.constant 0 : i32
    return %c0_i32, %c0_i32_0 : i32, i32
  }
  func.func @transform_2(%arg0: i32, %arg1: i32) -> (i32, i32) {
    %c0_i32 = arith.constant 0 : i32
    %c0_i32_0 = arith.constant 0 : i32
    %c0_i32_1 = arith.constant 0 : i32
    return %c0_i32, %c0_i32_0 : i32, i32
  }
  func.func @transform_3(%arg0: i32, %arg1: i32) -> (i32, i32) {
    %c0_i32 = arith.constant 0 : i32
    %c0_i32_0 = arith.constant 0 : i32
    return %arg0, %c0_i32 : i32, i32
  }
}

</mosaic_0001>

<bundles_post_ra>
// kernel: tpu_custom_call.1
= control target key start
LH: loop header
LB: loop body
LE: loop exit
PB: predicated region body
PF: predicated region fallthrough
CT: control target
= control target key end

     0   :  { %8 = vsyncpa [#allocation4], 0  ;;  %s7902_s0 = inlined_call_operand.hbm [shape: bf16[4,2,25088], index: 0, kind: input, shape index: {}]   ;;  %s7903_s1 = inlined_call_operand.hbm [shape: bf16[2,25088], index: 1, kind: input, shape index: {}]   ;;  %s7904_s2 = inlined_call_operand.vmem [shape: f32[1,2], index: 2, kind: input, shape index: {}]   ;;  %s7905_s3 = inlined_call_operand.hbm [shape: f32[2,2], index: 3, kind: output, shape index: {}]  }
   0x1   :  { %9 = vsyncpa [#allocation7], 0 }
   0x2   :  { %10 = vsyncpa [#allocation5], 0  ;;  %s7522_s12 = smov [#allocation3]   ;;  %s7450_s16 = scalar_lea.hbm %s7902_s0, 12544 }
   0x3   :  { %s16_s13 = sshll.u32 %s7522_s12, 4  ;;  %p7451_p0 = scmp.ne.s32.totalorder %s7902_s0, %s7450_s16  ;;  %s17_s13 = int_to_ptr.vmem [resolvable:$true] %s16_s13 }
   0x4   :  { %p7454_p1 = scmp.lt.u32.totalorder %s7450_s16, %s7902_s0 }
   0x6   :  { %p7456_p2 = pnand %p7454_p1, %p7451_p0 }
   0x8   :  { %7459 = shalt.err (!%p7456_p2)
}
   0x9   :  { %s7460_s21 = scalar_lea.vmem %s17_s13, 12544  ;;  %p7465_p4 = scmp.lt.s32.totalorder %s17_s13, %s17_s13 }
   0xa   :  { %p7461_p3 = scmp.ne.s32.totalorder %s17_s13, %s7460_s21  ;;  %p7466_p5 = scmp.lt.s32.totalorder %s7460_s21, %s7460_s21 }
   0xc   :  { %p7467_p6 = por %p7466_p5, %p7465_p4 }
   0xe   :  { %p7468_p7 = pnand %p7467_p6, %p7461_p3 }
  0x10   :  { %7471 = shalt.err (!%p7468_p7)
}
  0x11   :  { %s7523_s22 = smov 3136   ;;  %s7524_s23 = smov 196  }
  0x12   :  { %22 = dma.hbm_to_vmem [thread:$0]  %s7902_s0, 12544, %s17_s13, [#allocation4], %s7523_s22, %s7523_s22, %s7524_s23  }
  0x13   :  { %s7525_s26 = smov [#allocation6]   ;;  %s7472_s30 = scalar_lea.hbm %s7903_s1, 3136 }
  0x14   :  { %s29_s27 = sshll.u32 %s7525_s26, 4  ;;  %p7473_p8 = scmp.ne.s32.totalorder %s7903_s1, %s7472_s30  ;;  %s30_s27 = int_to_ptr.vmem [resolvable:$true] %s29_s27 }
  0x15   :  { %p7476_p9 = scmp.lt.u32.totalorder %s7472_s30, %s7903_s1 }
  0x17   :  { %p7478_p10 = pnand %p7476_p9, %p7473_p8 }
  0x19   :  { %7481 = shalt.err (!%p7478_p10)
}
  0x1a   :  { %s7482_s8 = scalar_lea.vmem %s30_s27, 3136  ;;  %p7487_p12 = scmp.lt.s32.totalorder %s30_s27, %s30_s27 }
  0x1b   :  { %p7483_p11 = scmp.ne.s32.totalorder %s30_s27, %s7482_s8  ;;  %p7488_p13 = scmp.lt.s32.totalorder %s7482_s8, %s7482_s8 }
  0x1d   :  { %p7489_p0 = por %p7488_p13, %p7487_p12 }
  0x1f   :  { %p7490_p1 = pnand %p7489_p0, %p7483_p11 }
  0x21   :  { %7493 = shalt.err (!%p7490_p1)
}
  0x22   :  { %32 = dma.hbm_to_vmem [thread:$0]  %s7903_s1, 3136, %s30_s27, [#allocation7]  }
  0x23   :  { %7516 = dma.done.wait [#allocation4], 12544  }
  0x24   :  { %7517 = vsyncadd [#allocation4], 4294954752 }
  0x25   :  { %7518 = dma.done.wait [#allocation7], 3136  }
  0x26   :  { %7519 = vsyncadd [#allocation7], 4294964160  ;;  %v281_v0 = vlaneseq  ;;  %v7526_v1 = vmov 1966171168   ;;  %v220_v6 = vld [vmem:[#allocation6] sm:$0xff]  ;;  %v42_v8 = vld [vmem:[#allocation3] sm:$0xff] }
  0x27   :  { %v279_v2 = vunpack.c.l.s4 %v7526_v1  ;;  %v232_v7 = vld [vmem:[#allocation6 + $0x60] sm:$0xff]  ;;  %v1698_v9 = vcombine.high %v220_v6, %v220_v6  ;;  %v68_v13 = vld [vmem:[#allocation3 + $0xc4] sm:$0xff]  ;;  %v233_v63 = vld [vmem:[#allocation6 + $0x68] sm:$0xff]  ;;  %s7527_s11 = smov [#allocation8]   ;;  %vm7014_vm0 = vcmask 9216  }
  0x28   :  { %v282_v3 = vshrl.u32 %v281_v0, 7  ;;  %v2286_v11 = vcombine.high %v232_v7, %v232_v7  ;;  %v119_v14 = vld [vmem:[#allocation3 + $0x188] sm:$0xff]  ;;  %v93_v15 = vmax.bf16 %v68_v13, %v42_v8  ;;  %v54_v16 = vld [vmem:[#allocation3 + $0x60] sm:$0xff]  ;;  %s7022_s12 = sshll.u32 %s7527_s11, 4  ;;  %s7023_s12 = int_to_ptr.vmem [resolvable:$true] %s7022_s12 }
  0x29   :  { %v280_v4 = vunpack.c.0.s8 %v279_v2  ;;  %v80_v17 = vld [vmem:[#allocation3 + $0x124] sm:$0xff]  ;;  %v170_v21 = vld [vmem:[#allocation3 + $0x24c] sm:$0xff]  ;;  %s7494_s13 = scalar_lea.vmem %s7023_s12, 32  ;;  %p7499_p3 = scmp.lt.s32.totalorder %s7023_s12, %s7023_s12 }
  0x2a   :  { %v131_v22 = vld [vmem:[#allocation3 + $0x1e8] sm:$0xff]  ;;  %v144_v24 = vmax.bf16 %v119_v14, %v93_v15  ;;  %v105_v25 = vmax.bf16 %v80_v17, %v54_v16  ;;  %v221_v14 = vld [vmem:[#allocation6 + $0x8] sm:$0xff]  ;;  %p7495_p2 = scmp.ne.s32.totalorder %s7023_s12, %s7494_s13  ;;  %p7500_p4 = scmp.lt.s32.totalorder %s7494_s13, %s7494_s13 }
  0x2b   :  { %v7572_v5 = vsub.s32 %v280_v4, %v282_v3  ;;  %v182_v29 = vld [vmem:[#allocation3 + $0x2ac] sm:$0xff] }
  0x2c   :  { %v195_v32 = vmax.bf16 %v170_v21, %v144_v24  ;;  %v156_v33 = vmax.bf16 %v131_v22, %v105_v25  ;;  %v55_v61 = vld [vmem:[#allocation3 + $0x68] sm:$0xff]  ;;  %v132_v3 = vld [vmem:[#allocation3 + $0x1f0] sm:$0xff]  ;;  %p7501_p5 = por %p7500_p4, %p7499_p3 }
  0x2d   :  { %v1705_v10 = vrot.slane %v220_v6, %v7572_v5  ;;  %v2293_v12 = vrot.slane %v232_v7, %v7572_v5  ;;  %v2300_v26 = vrot.slane %v2286_v11, %v7572_v5  ;;  %v1712_v30 = vrot.slane %v1698_v9, %v7572_v5  ;;  %v81_v62 = vld [vmem:[#allocation3 + $0x12c] sm:$0xff]  ;;  %v183_v11 = vld [vmem:[#allocation3 + $0x2b4] sm:$0xff] }
  0x2e   :  { %v284_v37 = vrot.slane %v195_v32, %v7572_v5  ;;  %v207_v38 = vmax.bf16 %v182_v29, %v156_v33  ;;  %v277_v46 = vcombine.high %v195_v32, %v195_v32  ;;  %v106_v1 = vmax.bf16 %v81_v62, %v55_v61  ;;  %v69_v13 = vld [vmem:[#allocation3 + $0xcc] sm:$0xff]  ;;  %p7502_p6 = pnand %p7501_p5, %p7495_p2 }
  0x2f   :  { %v1713_v18 = vcombine.high %v1705_v10, %v1705_v10  ;;  %v2301_v19 = vcombine.high %v2293_v12, %v2293_v12  ;;  %v7577_v20 = vrot.slane %v2293_v12, %v7572_v5  ;;  %v1721_v23 = vrot.slane %v1705_v10, %v7572_v5  ;;  %v43_v12 = vld [vmem:[#allocation3 + $0x8] sm:$0xff] }
  0x30   :  { %v2302_v34 = vcombine.high %v2300_v26, %v2300_v26  ;;  %v1714_v40 = vcombine.high %v1712_v30, %v1712_v30  ;;  %v292_v41 = vcombine.high %v284_v37, %v284_v37  ;;  %v872_v42 = vrot.slane %v207_v38, %v7572_v5 }
  0x31   :  { %v1735_v27 = vrot.slane %v1713_v18, %v7572_v5  ;;  %v7583_v28 = vrot.slane %v2301_v19, %v7572_v5  ;;  %v2331_v31 = vcombine.high %v7577_v20, %v7577_v20  ;;  %v865_v43 = vcombine.high %v207_v38, %v207_v38 }
  0x32   :  { %v2330_v39 = vrot.slane %v2302_v34, %v7572_v5  ;;  %v1743_v44 = vcombine.high %v1721_v23, %v1721_v23  ;;  %v300_v45 = vrot.slane %v284_v37, %v7572_v5  ;;  %v314_v47 = vrot.slane %v292_v41, %v7572_v5 }
  0x33   :  { %v1745_v35 = vcombine.high %v1735_v27, %v1735_v27  ;;  %3094 = vmatprep.subr.bf16.mxu1 %v1735_v27  ;;  %v2333_v36 = vcombine.high %v7583_v28, %v7583_v28  ;;  %v880_v48 = vcombine.high %v872_v42, %v872_v42  ;;  %v7596_v49 = vrot.slane %v872_v42, %v7572_v5  ;;  %v171_v27 = vld [vmem:[#allocation3 + $0x254] sm:$0xff] }
  0x34   :  { %3095 = vmatpush1.bf16.xpose.msra.mxu1 %v1721_v23  ;;  %v1742_v50 = vrot.slane %v1714_v40, %v7572_v5  ;;  %v879_v51 = vrot.slane %v865_v43, %v7572_v5  ;;  %v324_v52 = vcombine.high %v314_v47, %v314_v47  ;;  %3126 = vmatprep.mubr.bf16.mxu1 %v314_v47  ;;  %v120_v23 = vld [vmem:[#allocation3 + $0x190] sm:$0xff] }
  0x35   :  { %5054 = vmatprep.subr.bf16.mxu0 %v2333_v36  ;;  %3134 = vmatprep.subr.bf16.mxu1 %v1745_v35  ;;  %v7601_v53 = vrot.slane %v880_v48, %v7572_v5  ;;  %v910_v54 = vcombine.high %v7596_v49, %v7596_v49  ;;  %v2316_v57 = vrot.slane %v2300_v26, %v7572_v5 }
  0x36   :  { %5055 = vmatpush1.bf16.xpose.msra.mxu0 %v2331_v31  ;;  %v881_v55 = vcombine.high %v879_v51, %v879_v51  ;;  %v291_v58 = vrot.slane %v277_v46, %v7572_v5  ;;  %v2334_v60 = vcombine.high %v2330_v39, %v2330_v39  ;;  %v2342_v2 = vrot.slane %v233_v63, %v7572_v5 }
  0x37   :  { %5094 = vmatprep.subr.bf16.mxu0 %v2330_v39  ;;  %v912_v56 = vcombine.high %v7601_v53, %v7601_v53  ;;  %v322_v4 = vcombine.high %v300_v45, %v300_v45  ;;  %v1728_v6 = vrot.slane %v1712_v30, %v7572_v5  ;;  %v157_v8 = vmax.bf16 %v132_v3, %v106_v1 }
  0x38   :  { %v909_v59 = vrot.slane %v881_v55, %v7572_v5  ;;  %v293_v0 = vcombine.high %v291_v58, %v291_v58  ;;  %v1746_v9 = vcombine.high %v1742_v50, %v1742_v50  ;;  %v2350_v10 = vcombine.high %v2342_v2, %v2342_v2 }
  0x39   :  { %5086 = vmatprep.mubr.bf16.mxu0 %v912_v56  ;;  %v895_v15 = vrot.slane %v879_v51, %v7572_v5  ;;  %v2332_v16 = vcombine.high %v2316_v57, %v2316_v57  ;;  %v208_v18 = vmax.bf16 %v183_v11, %v157_v8  ;;  %v94_v19 = vmax.bf16 %v69_v13, %v43_v12  ;;  %v82_v8 = vld [vmem:[#allocation3 + $0x134] sm:$0xff] }
  0x3a   :  { %v321_v7 = vrot.slane %v293_v0, %v7572_v5  ;;  %v913_v17 = vcombine.high %v909_v59, %v909_v59  ;;  %v2372_v21 = vrot.slane %v2350_v10, %v7572_v5  ;;  %v1754_v22 = vrot.slane %v221_v14, %v7572_v5  ;;  %v133_v13 = vld [vmem:[#allocation3 + $0x1f8] sm:$0xff] }
  0x3b   :  { %3127 = vmatmul.mubr.bf16.vlgmr.msra.gmra.mrb[0].mxu1 %v300_v45  ;;  %v921_v24 = vrot.slane %v208_v18, %v7572_v5  ;;  %v145_v25 = vmax.bf16 %v120_v23, %v94_v19  ;;  %v307_v29 = vrot.slane %v291_v58, %v7572_v5  ;;  %v1744_v30 = vcombine.high %v1728_v6, %v1728_v6  ;;  %v70_v23 = vld [vmem:[#allocation3 + $0xd4] sm:$0xff] }
  0x3c   :  { %3135 = vmatpush1.bf16.xpose.msra.mxu1 %v1743_v44  ;;  %3166 = vmatprep.mubr.bf16.mxu1 %v324_v52  ;;  %v1762_v26 = vcombine.high %v1754_v22, %v1754_v22  ;;  %v325_v31 = vcombine.high %v321_v7, %v321_v7  ;;  %v911_v35 = vcombine.high %v895_v15, %v895_v15 }
  0x3d   :  { %3174 = vmatprep.subr.bf16.mxu1 %v1742_v50  ;;  %5087 = vmatmul.mubr.bf16.vlgmr.msra.gmra.mrb[0].mxu0 %v910_v54  ;;  %v929_v32 = vcombine.high %v921_v24, %v921_v24  ;;  %v196_v33 = vmax.bf16 %v171_v27, %v145_v25  ;;  %v2358_v36 = vrot.slane %v2342_v2, %v7572_v5 }
  0x3e   :  { %5095 = vmatpush1.bf16.xpose.msra.mxu0 %v2316_v57  ;;  %5126 = vmatprep.mubr.bf16.mxu0 %v909_v59  ;;  %v1784_v34 = vrot.slane %v1762_v26, %v7572_v5  ;;  %v2382_v39 = vcombine.high %v2372_v21, %v2372_v21  ;;  %v2335_v40 = vcombine.high %v233_v63, %v233_v63 }
  0x3f   :  { %5134 = vmatprep.subr.bf16.mxu0 %v2334_v60  ;;  %v951_v37 = vrot.slane %v929_v32, %v7572_v5  ;;  %v333_v38 = vrot.slane %v196_v33, %v7572_v5  ;;  %v323_v43 = vcombine.high %v307_v29, %v307_v29  ;;  %v1770_v44 = vrot.slane %v1754_v22, %v7572_v5  ;;  %v44_v22 = vld [vmem:[#allocation3 + $0x10] sm:$0xff] }
  0x40   :  { %v2349_v42 = vrot.slane %v2335_v40, %v7572_v5  ;;  %v1794_v46 = vcombine.high %v1784_v34, %v1784_v34  ;;  %v1747_v48 = vcombine.high %v221_v14, %v221_v14  ;;  %v937_v50 = vrot.slane %v921_v24, %v7572_v5  ;;  %v222_v24 = vld [vmem:[#allocation6 + $0x10] sm:$0xff] }
  0x41   :  { %v341_v41 = vcombine.high %v333_v38, %v333_v38  ;;  %v2380_v51 = vcombine.high %v2358_v36, %v2358_v36  ;;  %v961_v52 = vcombine.high %v951_v37, %v951_v37  ;;  %v914_v54 = vcombine.high %v208_v18, %v208_v18 }
  0x42   :  { %v2351_v47 = vcombine.high %v2349_v42, %v2349_v42  ;;  %v1761_v56 = vrot.slane %v1747_v48, %v7572_v5  ;;  %v349_v59 = vrot.slane %v333_v38, %v7572_v5  ;;  %v1792_v60 = vcombine.high %v1770_v44, %v1770_v44 }
  0x43   :  { %v363_v45 = vrot.slane %v341_v41, %v7572_v5  ;;  %v928_v57 = vrot.slane %v914_v54, %v7572_v5  ;;  %v326_v63 = vcombine.high %v196_v33, %v196_v33  ;;  %v959_v1 = vcombine.high %v937_v50, %v937_v50  ;;  %v121_v33 = vld [vmem:[#allocation3 + $0x198] sm:$0xff] }
  0x44   :  { %v2379_v55 = vrot.slane %v2351_v47, %v7572_v5  ;;  %v1763_v58 = vcombine.high %v1761_v56, %v1761_v56  ;;  %v2365_v2 = vrot.slane %v2349_v42, %v7572_v5  ;;  %v371_v14 = vcombine.high %v349_v59, %v349_v59 }
  0x45   :  { %v373_v61 = vcombine.high %v363_v45, %v363_v45  ;;  %v930_v62 = vcombine.high %v928_v57, %v928_v57  ;;  %v944_v25 = vrot.slane %v928_v57, %v7572_v5  ;;  %v1803_v32 = vrot.slane %v222_v24, %v7572_v5 }
  0x46   :  { %v1791_v0 = vrot.slane %v1763_v58, %v7572_v5  ;;  %v2381_v26 = vcombine.high %v2365_v2, %v2365_v2 }
  0x47   :  { %3167 = vmatmul.mubr.bf16.vlgmr.msra.gmra.mrb[0].mxu1 %v322_v4  ;;  %v958_v3 = vrot.slane %v930_v62, %v7572_v5  ;;  %v340_v4 = vrot.slane %v326_v63, %v7572_v5 }
  0x48   :  { %3175 = vmatpush1.bf16.xpose.msra.mxu1 %v1728_v6  ;;  %3206 = vmatprep.mubr.bf16.mxu1 %v321_v7  ;;  %v2383_v6 = vcombine.high %v2379_v55, %v2379_v55  ;;  %v56_v7 = vld [vmem:[#allocation3 + $0x70] sm:$0xff]  ;;  %v1795_v18 = vcombine.high %v1791_v0, %v1791_v0 }
  0x49   :  { %3214 = vmatprep.subr.bf16.mxu1 %v1746_v9  ;;  %5127 = vmatmul.mubr.bf16.vlgmr.msra.gmra.mrb[0].mxu0 %v895_v15  ;;  %v234_v9 = vld [vmem:[#allocation6 + $0x70] sm:$0xff]  ;;  %v342_v10 = vcombine.high %v340_v4, %v340_v4  ;;  %v107_v11 = vmax.bf16 %v82_v8, %v56_v7  ;;  %v1777_v15 = vrot.slane %v1761_v56, %v7572_v5 }
  0x4a   :  { %5135 = vmatpush1.bf16.xpose.msra.mxu0 %v2332_v16  ;;  %5166 = vmatprep.mubr.bf16.mxu0 %v913_v17  ;;  %v2391_v12 = vrot.slane %v234_v9, %v7572_v5  ;;  %v962_v27 = vcombine.high %v958_v3, %v958_v3  ;;  %v356_v38 = vrot.slane %v340_v4, %v7572_v5 }
  0x4b   :  { %5174 = vmatprep.subr.bf16.mxu0 %v2372_v21  ;;  %v370_v16 = vrot.slane %v342_v10, %v7572_v5  ;;  %v158_v17 = vmax.bf16 %v133_v13, %v107_v11  ;;  %v184_v21 = vld [vmem:[#allocation3 + $0x2bc] sm:$0xff] }
  0x4c   :  { %v2399_v19 = vcombine.high %v2391_v12, %v2391_v12  ;;  %v372_v54 = vcombine.high %v356_v38, %v356_v38 }
  0x4d   :  { %v374_v40 = vcombine.high %v370_v16, %v370_v16 }
  0x53   :  { %3207 = vmatmul.mubr.bf16.vlgmr.msra.gmra.mrb[0].mxu1 %v307_v29  ;;  %v209_v29 = vmax.bf16 %v184_v21, %v158_v17  ;;  %v83_v17 = vld [vmem:[#allocation3 + $0x13c] sm:$0xff] }
  0x54   :  { %3215 = vmatpush1.bf16.xpose.msra.mxu1 %v1744_v30  ;;  %3246 = vmatprep.mubr.bf16.mxu1 %v325_v31  ;;  %v95_v30 = vmax.bf16 %v70_v23, %v44_v22  ;;  %v2421_v31 = vrot.slane %v2399_v19, %v7572_v5  ;;  %v134_v23 = vld [vmem:[#allocation3 + $0x200] sm:$0xff] }
  0x55   :  { %3254 = vmatprep.subr.bf16.mxu1 %v1784_v34  ;;  %5167 = vmatmul.mubr.bf16.vlgmr.msra.gmra.mrb[0].mxu0 %v911_v35  ;;  %v970_v34 = vrot.slane %v209_v29, %v7572_v5  ;;  %v963_v63 = vcombine.high %v209_v29, %v209_v29 }
  0x56   :  { %5175 = vmatpush1.bf16.xpose.msra.mxu0 %v2358_v36  ;;  %5206 = vmatprep.mubr.bf16.mxu0 %v951_v37  ;;  %v146_v35 = vmax.bf16 %v121_v33, %v95_v30  ;;  %v1811_v36 = vcombine.high %v1803_v32, %v1803_v32  ;;  %v172_v37 = vld [vmem:[#allocation3 + $0x25c] sm:$0xff]  ;;  %v2431_v48 = vcombine.high %v2421_v31, %v2421_v31 }
  0x57   :  { %5214 = vmatprep.subr.bf16.mxu0 %v2382_v39  ;;  %v1793_v39 = vcombine.high %v1777_v15, %v1777_v15  ;;  %v978_v41 = vcombine.high %v970_v34, %v970_v34  ;;  %v71_v33 = vld [vmem:[#allocation3 + $0xdc] sm:$0xff] }
  0x58   :  { %v197_v42 = vmax.bf16 %v172_v37, %v146_v35 }
  0x5a   :  { %v382_v47 = vrot.slane %v197_v42, %v7572_v5 }
  0x5c   :  { %v398_v4 = vrot.slane %v382_v47, %v7572_v5 }
  0x5f   :  { %3247 = vmatmul.mubr.bf16.vlgmr.msra.gmra.mrb[0].mxu1 %v323_v43  ;;  %v1833_v43 = vrot.slane %v1811_v36, %v7572_v5 }
  0x60   :  { %3255 = vmatpush1.bf16.xpose.msra.mxu1 %v1770_v44  ;;  %3286 = vmatprep.mubr.bf16.mxu1 %v363_v45  ;;  %v960_v44 = vcombine.high %v944_v25, %v944_v25  ;;  %v2407_v45 = vrot.slane %v2391_v12, %v7572_v5 }
  0x61   :  { %3294 = vmatprep.subr.bf16.mxu1 %v1794_v46  ;;  %5207 = vmatmul.mubr.bf16.vlgmr.msra.gmra.mrb[0].mxu0 %v937_v50  ;;  %v1000_v46 = vrot.slane %v978_v41, %v7572_v5  ;;  %v2384_v50 = vcombine.high %v234_v9, %v234_v9  ;;  %v1843_v57 = vcombine.high %v1833_v43, %v1833_v43 }
  0x62   :  { %5215 = vmatpush1.bf16.xpose.msra.mxu0 %v2380_v51  ;;  %5246 = vmatprep.mubr.bf16.mxu0 %v961_v52  ;;  %v390_v51 = vcombine.high %v382_v47, %v382_v47  ;;  %v375_v9 = vcombine.high %v197_v42, %v197_v42  ;;  %v122_v42 = vld [vmem:[#allocation3 + $0x1a0] sm:$0xff] }
  0x63   :  { %5254 = vmatprep.subr.bf16.mxu0 %v2379_v55  ;;  %v2398_v52 = vrot.slane %v2384_v50, %v7572_v5  ;;  %v1819_v55 = vrot.slane %v1803_v32, %v7572_v5  ;;  %v1010_v62 = vcombine.high %v1000_v46, %v1000_v46  ;;  %v45_v32 = vld [vmem:[#allocation3 + $0x18] sm:$0xff] }
  0x64   :  { %v412_v56 = vrot.slane %v390_v51, %v7572_v5 }
  0x65   :  { %v2400_v58 = vcombine.high %v2398_v52, %v2398_v52  ;;  %v2414_v12 = vrot.slane %v2398_v52, %v7572_v5 }
  0x66   :  { %v422_v7 = vcombine.high %v412_v56, %v412_v56 }
  0x67   :  { %v2430_v36 = vcombine.high %v2414_v12, %v2414_v12 }
  0x6b   :  { %3287 = vmatmul.mubr.bf16.vlgmr.msra.gmra.mrb[0].mxu1 %v349_v59  ;;  %v1796_v59 = vcombine.high %v222_v24, %v222_v24  ;;  %v420_v24 = vcombine.high %v398_v4, %v398_v4 }
  0x6c   :  { %3295 = vmatpush1.bf16.xpose.msra.mxu1 %v1792_v60  ;;  %3326 = vmatprep.mubr.bf16.mxu1 %v373_v61  ;;  %v986_v60 = vrot.slane %v970_v34, %v7572_v5  ;;  %v2429_v61 = vcombine.high %v2407_v45, %v2407_v45  ;;  %v223_v34 = vld [vmem:[#allocation6 + $0x18] sm:$0xff] }
  0x6d   :  { %3334 = vmatprep.subr.bf16.mxu1 %v1791_v0  ;;  %5247 = vmatmul.mubr.bf16.vlgmr.msra.gmra.mrb[0].mxu0 %v959_v1  ;;  %v2428_v0 = vrot.slane %v2400_v58, %v7572_v5  ;;  %v1810_v1 = vrot.slane %v1796_v59, %v7572_v5  ;;  %v1852_v41 = vrot.slane %v223_v34, %v7572_v5 }
  0x6e   :  { %5255 = vmatpush1.bf16.xpose.msra.mxu0 %v2365_v2  ;;  %5286 = vmatprep.mubr.bf16.mxu0 %v958_v3  ;;  %v977_v2 = vrot.slane %v963_v63, %v7572_v5  ;;  %v1008_v11 = vcombine.high %v986_v60, %v986_v60 }
  0x6f   :  { %5294 = vmatprep.subr.bf16.mxu0 %v2383_v6  ;;  %v1812_v3 = vcombine.high %v1810_v1, %v1810_v1  ;;  %v1841_v6 = vcombine.high %v1819_v55, %v1819_v55 }
  0x70   :  { %v979_v8 = vcombine.high %v977_v2, %v977_v2  ;;  %v993_v35 = vrot.slane %v977_v2, %v7572_v5 }
  0x71   :  { %v1840_v10 = vrot.slane %v1812_v3, %v7572_v5 }
  0x72   :  { %v1007_v13 = vrot.slane %v979_v8, %v7572_v5 }
  0x73   :  { %v1844_v29 = vcombine.high %v1840_v10, %v1840_v10 }
  0x74   :  { %v1011_v37 = vcombine.high %v1007_v13, %v1007_v13 }
  0x77   :  { %3327 = vmatmul.mubr.bf16.vlgmr.msra.gmra.mrb[0].mxu1 %v371_v14  ;;  %v389_v14 = vrot.slane %v375_v9, %v7572_v5 }
  0x78   :  { %3335 = vmatpush1.bf16.xpose.msra.mxu1 %v1777_v15  ;;  %3366 = vmatprep.mubr.bf16.mxu1 %v370_v16  ;;  %v2432_v15 = vcombine.high %v2428_v0, %v2428_v0  ;;  %v57_v16 = vld [vmem:[#allocation3 + $0x78] sm:$0xff] }
  0x79   :  { %3374 = vmatprep.subr.bf16.mxu1 %v1795_v18  ;;  %5287 = vmatmul.mubr.bf16.vlgmr.msra.gmra.mrb[0].mxu0 %v944_v25  ;;  %v235_v18 = vld [vmem:[#allocation6 + $0x78] sm:$0xff]  ;;  %v391_v19 = vcombine.high %v389_v14, %v389_v14  ;;  %v108_v21 = vmax.bf16 %v83_v17, %v57_v16  ;;  %v1826_v25 = vrot.slane %v1810_v1, %v7572_v5 }
  0x7a   :  { %5295 = vmatpush1.bf16.xpose.msra.mxu0 %v2381_v26  ;;  %5326 = vmatprep.mubr.bf16.mxu0 %v962_v27  ;;  %v2440_v22 = vrot.slane %v235_v18, %v7572_v5  ;;  %v405_v47 = vrot.slane %v389_v14, %v7572_v5 }
  0x7b   :  { %5334 = vmatprep.subr.bf16.mxu0 %v2421_v31  ;;  %v419_v26 = vrot.slane %v391_v19, %v7572_v5  ;;  %v159_v27 = vmax.bf16 %v134_v23, %v108_v21  ;;  %v185_v31 = vld [vmem:[#allocation3 + $0x2c4] sm:$0xff] }
  0x7c   :  { %v2448_v30 = vcombine.high %v2440_v22, %v2440_v22  ;;  %v421_v63 = vcombine.high %v405_v47, %v405_v47 }
  0x7d   :  { %v423_v50 = vcombine.high %v419_v26, %v419_v26 }
  0x83   :  { %3367 = vmatmul.mubr.bf16.vlgmr.msra.gmra.mrb[0].mxu1 %v356_v38  ;;  %v210_v38 = vmax.bf16 %v185_v31, %v159_v27  ;;  %v84_v27 = vld [vmem:[#allocation3 + $0x144] sm:$0xff] }
  0x84   :  { %3375 = vmatpush1.bf16.xpose.msra.mxu1 %v1793_v39  ;;  %3406 = vmatprep.mubr.bf16.mxu1 %v374_v40  ;;  %v96_v39 = vmax.bf16 %v71_v33, %v45_v32  ;;  %v2470_v40 = vrot.slane %v2448_v30, %v7572_v5  ;;  %v135_v33 = vld [vmem:[#allocation3 + $0x208] sm:$0xff] }
  0x85   :  { %3414 = vmatprep.subr.bf16.mxu1 %v1833_v43  ;;  %5327 = vmatmul.mubr.bf16.vlgmr.msra.gmra.mrb[0].mxu0 %v960_v44  ;;  %v1019_v43 = vrot.slane %v210_v38, %v7572_v5  ;;  %v1012_v9 = vcombine.high %v210_v38, %v210_v38 }
  0x86   :  { %5335 = vmatpush1.bf16.xpose.msra.mxu0 %v2407_v45  ;;  %5366 = vmatprep.mubr.bf16.mxu0 %v1000_v46  ;;  %v147_v44 = vmax.bf16 %v122_v42, %v96_v39  ;;  %v1860_v45 = vcombine.high %v1852_v41, %v1852_v41  ;;  %v173_v46 = vld [vmem:[#allocation3 + $0x264] sm:$0xff]  ;;  %v2480_v59 = vcombine.high %v2470_v40, %v2470_v40 }
  0x87   :  { %5374 = vmatprep.subr.bf16.mxu0 %v2431_v48  ;;  %v1842_v48 = vcombine.high %v1826_v25, %v1826_v25  ;;  %v1027_v51 = vcombine.high %v1019_v43, %v1019_v43  ;;  %v72_v42 = vld [vmem:[#allocation3 + $0xe4] sm:$0xff] }
  0x88   :  { %v198_v52 = vmax.bf16 %v173_v46, %v147_v44 }
  0x8a   :  { %v431_v58 = vrot.slane %v198_v52, %v7572_v5 }
  0x8c   :  { %v447_v14 = vrot.slane %v431_v58, %v7572_v5 }
  0x8f   :  { %3407 = vmatmul.mubr.bf16.vlgmr.msra.gmra.mrb[0].mxu1 %v372_v54  ;;  %v1882_v54 = vrot.slane %v1860_v45, %v7572_v5 }
  0x90   :  { %3415 = vmatpush1.bf16.xpose.msra.mxu1 %v1819_v55  ;;  %3446 = vmatprep.mubr.bf16.mxu1 %v412_v56  ;;  %v1009_v55 = vcombine.high %v993_v35, %v993_v35  ;;  %v2456_v56 = vrot.slane %v2440_v22, %v7572_v5 }
  0x91   :  { %3454 = vmatprep.subr.bf16.mxu1 %v1843_v57  ;;  %5367 = vmatmul.mubr.bf16.vlgmr.msra.gmra.mrb[0].mxu0 %v986_v60  ;;  %v1049_v57 = vrot.slane %v1027_v51, %v7572_v5  ;;  %v2433_v60 = vcombine.high %v235_v18, %v235_v18  ;;  %v1892_v2 = vcombine.high %v1882_v54, %v1882_v54 }
  0x92   :  { %5375 = vmatpush1.bf16.xpose.msra.mxu0 %v2429_v61  ;;  %5406 = vmatprep.mubr.bf16.mxu0 %v1010_v62  ;;  %v439_v61 = vcombine.high %v431_v58, %v431_v58  ;;  %v424_v18 = vcombine.high %v198_v52, %v198_v52  ;;  %v123_v52 = vld [vmem:[#allocation3 + $0x1a8] sm:$0xff] }
  0x93   :  { %5414 = vmatprep.subr.bf16.mxu0 %v2428_v0  ;;  %v2447_v62 = vrot.slane %v2433_v60, %v7572_v5  ;;  %v1868_v0 = vrot.slane %v1852_v41, %v7572_v5  ;;  %v1059_v8 = vcombine.high %v1049_v57, %v1049_v57  ;;  %v46_v41 = vld [vmem:[#allocation3 + $0x20] sm:$0xff] }
  0x94   :  { %v461_v1 = vrot.slane %v439_v61, %v7572_v5 }
  0x95   :  { %v2449_v3 = vcombine.high %v2447_v62, %v2447_v62  ;;  %v2463_v22 = vrot.slane %v2447_v62, %v7572_v5 }
  0x96   :  { %v471_v16 = vcombine.high %v461_v1, %v461_v1 }
  0x97   :  { %v2479_v45 = vcombine.high %v2463_v22, %v2463_v22 }
  0x9b   :  { %3447 = vmatmul.mubr.bf16.vlgmr.msra.gmra.mrb[0].mxu1 %v398_v4  ;;  %v1845_v4 = vcombine.high %v223_v34, %v223_v34  ;;  %v469_v34 = vcombine.high %v447_v14, %v447_v14 }
  0x9c   :  { %3455 = vmatpush1.bf16.xpose.msra.mxu1 %v1841_v6  ;;  %3486 = vmatprep.mubr.bf16.mxu1 %v422_v7  ;;  %v1035_v6 = vrot.slane %v1019_v43, %v7572_v5  ;;  %v2478_v7 = vcombine.high %v2456_v56, %v2456_v56  ;;  %v224_v43 = vld [vmem:[#allocation6 + $0x20] sm:$0xff] }
  0x9d   :  { %3494 = vmatprep.subr.bf16.mxu1 %v1840_v10  ;;  %5407 = vmatmul.mubr.bf16.vlgmr.msra.gmra.mrb[0].mxu0 %v1008_v11  ;;  %v2477_v10 = vrot.slane %v2449_v3, %v7572_v5  ;;  %v1859_v11 = vrot.slane %v1845_v4, %v7572_v5  ;;  %v1901_v51 = vrot.slane %v224_v43, %v7572_v5 }
  0x9e   :  { %5415 = vmatpush1.bf16.xpose.msra.mxu0 %v2414_v12  ;;  %5446 = vmatprep.mubr.bf16.mxu0 %v1007_v13  ;;  %v1026_v12 = vrot.slane %v1012_v9, %v7572_v5  ;;  %v1057_v21 = vcombine.high %v1035_v6, %v1035_v6 }
  0x9f   :  { %5454 = vmatprep.subr.bf16.mxu0 %v2432_v15  ;;  %v1861_v13 = vcombine.high %v1859_v11, %v1859_v11  ;;  %v1890_v15 = vcombine.high %v1868_v0, %v1868_v0 }
  0xa0   :  { %v1028_v17 = vcombine.high %v1026_v12, %v1026_v12  ;;  %v1042_v44 = vrot.slane %v1026_v12, %v7572_v5 }
  0xa1   :  { %v1889_v19 = vrot.slane %v1861_v13, %v7572_v5 }
  0xa2   :  { %v1056_v23 = vrot.slane %v1028_v17, %v7572_v5 }
  0xa3   :  { %v1893_v38 = vcombine.high %v1889_v19, %v1889_v19 }
  0xa4   :  { %v1060_v46 = vcombine.high %v1056_v23, %v1056_v23 }
  0xa7   :  { %3487 = vmatmul.mubr.bf16.vlgmr.msra.gmra.mrb[0].mxu1 %v420_v24  ;;  %v438_v24 = vrot.slane %v424_v18, %v7572_v5 }
  0xa8   :  { %3495 = vmatpush1.bf16.xpose.msra.mxu1 %v1826_v25  ;;  %3526 = vmatprep.mubr.bf16.mxu1 %v419_v26  ;;  %v2481_v25 = vcombine.high %v2477_v10, %v2477_v10  ;;  %v58_v26 = vld [vmem:[#allocation3 + $0x80] sm:$0xff] }
  0xa9   :  { %3534 = vmatprep.subr.bf16.mxu1 %v1844_v29  ;;  %5447 = vmatmul.mubr.bf16.vlgmr.msra.gmra.mrb[0].mxu0 %v993_v35  ;;  %v236_v29 = vld [vmem:[#allocation6 + $0x80] sm:$0xff]  ;;  %v440_v30 = vcombine.high %v438_v24, %v438_v24  ;;  %v109_v31 = vmax.bf16 %v84_v27, %v58_v26  ;;  %v1875_v35 = vrot.slane %v1859_v11, %v7572_v5 }
  0xaa   :  { %5455 = vmatpush1.bf16.xpose.msra.mxu0 %v2430_v36  ;;  %5486 = vmatprep.mubr.bf16.mxu0 %v1011_v37  ;;  %v2489_v32 = vrot.slane %v236_v29, %v7572_v5  ;;  %v454_v58 = vrot.slane %v438_v24, %v7572_v5 }
  0xab   :  { %5494 = vmatprep.subr.bf16.mxu0 %v2470_v40  ;;  %v468_v36 = vrot.slane %v440_v30, %v7572_v5  ;;  %v160_v37 = vmax.bf16 %v135_v33, %v109_v31  ;;  %v186_v40 = vld [vmem:[#allocation3 + $0x2cc] sm:$0xff] }
  0xac   :  { %v2497_v39 = vcombine.high %v2489_v32, %v2489_v32  ;;  %v470_v9 = vcombine.high %v454_v58, %v454_v58 }
  0xad   :  { %v472_v60 = vcombine.high %v468_v36, %v468_v36 }
  0xb3   :  { %3527 = vmatmul.mubr.bf16.vlgmr.msra.gmra.mrb[0].mxu1 %v405_v47  ;;  %v211_v47 = vmax.bf16 %v186_v40, %v160_v37  ;;  %v85_v37 = vld [vmem:[#allocation3 + $0x14c] sm:$0xff] }
  0xb4   :  { %3535 = vmatpush1.bf16.xpose.msra.mxu1 %v1842_v48  ;;  %3566 = vmatprep.mubr.bf16.mxu1 %v423_v50  ;;  %v97_v48 = vmax.bf16 %v72_v42, %v46_v41  ;;  %v2519_v50 = vrot.slane %v2497_v39, %v7572_v5  ;;  %v136_v42 = vld [vmem:[#allocation3 + $0x210] sm:$0xff] }
  0xb5   :  { %3574 = vmatprep.subr.bf16.mxu1 %v1882_v54  ;;  %5487 = vmatmul.mubr.bf16.vlgmr.msra.gmra.mrb[0].mxu0 %v1009_v55  ;;  %v1068_v54 = vrot.slane %v211_v47, %v7572_v5  ;;  %v1061_v18 = vcombine.high %v211_v47, %v211_v47 }
  0xb6   :  { %5495 = vmatpush1.bf16.xpose.msra.mxu0 %v2456_v56  ;;  %5526 = vmatprep.mubr.bf16.mxu0 %v1049_v57  ;;  %v148_v55 = vmax.bf16 %v123_v52, %v97_v48  ;;  %v1909_v56 = vcombine.high %v1901_v51, %v1901_v51  ;;  %v174_v57 = vld [vmem:[#allocation3 + $0x26c] sm:$0xff]  ;;  %v2529_v4 = vcombine.high %v2519_v50, %v2519_v50 }
  0xb7   :  { %5534 = vmatprep.subr.bf16.mxu0 %v2480_v59  ;;  %v1891_v59 = vcombine.high %v1875_v35, %v1875_v35  ;;  %v1076_v61 = vcombine.high %v1068_v54, %v1068_v54  ;;  %v73_v52 = vld [vmem:[#allocation3 + $0xec] sm:$0xff] }
  0xb8   :  { %v199_v62 = vmax.bf16 %v174_v57, %v148_v55 }
  0xba   :  { %v480_v3 = vrot.slane %v199_v62, %v7572_v5 }
  0xbc   :  { %v496_v24 = vrot.slane %v480_v3, %v7572_v5 }
  0xbf   :  { %3567 = vmatmul.mubr.bf16.vlgmr.msra.gmra.mrb[0].mxu1 %v421_v63  ;;  %v1931_v63 = vrot.slane %v1909_v56, %v7572_v5 }
  0xc0   :  { %3575 = vmatpush1.bf16.xpose.msra.mxu1 %v1868_v0  ;;  %3606 = vmatprep.mubr.bf16.mxu1 %v461_v1  ;;  %v1058_v0 = vcombine.high %v1042_v44, %v1042_v44  ;;  %v2505_v1 = vrot.slane %v2489_v32, %v7572_v5 }
  0xc1   :  { %3614 = vmatprep.subr.bf16.mxu1 %v1892_v2  ;;  %5527 = vmatmul.mubr.bf16.vlgmr.msra.gmra.mrb[0].mxu0 %v1035_v6  ;;  %v1098_v2 = vrot.slane %v1076_v61, %v7572_v5  ;;  %v2482_v6 = vcombine.high %v236_v29, %v236_v29  ;;  %v1941_v12 = vcombine.high %v1931_v63, %v1931_v63 }
  0xc2   :  { %5535 = vmatpush1.bf16.xpose.msra.mxu0 %v2478_v7  ;;  %5566 = vmatprep.mubr.bf16.mxu0 %v1059_v8  ;;  %v488_v7 = vcombine.high %v480_v3, %v480_v3  ;;  %v473_v29 = vcombine.high %v199_v62, %v199_v62  ;;  %v124_v62 = vld [vmem:[#allocation3 + $0x1b0] sm:$0xff] }
  0xc3   :  { %5574 = vmatprep.subr.bf16.mxu0 %v2477_v10  ;;  %v2496_v8 = vrot.slane %v2482_v6, %v7572_v5  ;;  %v1917_v10 = vrot.slane %v1901_v51, %v7572_v5  ;;  %v1108_v17 = vcombine.high %v1098_v2, %v1098_v2  ;;  %v47_v51 = vld [vmem:[#allocation3 + $0x28] sm:$0xff] }
  0xc4   :  { %v510_v11 = vrot.slane %v488_v7, %v7572_v5 }
  0xc5   :  { %v2498_v13 = vcombine.high %v2496_v8, %v2496_v8  ;;  %v2512_v32 = vrot.slane %v2496_v8, %v7572_v5 }
  0xc6   :  { %v520_v26 = vcombine.high %v510_v11, %v510_v11 }
  0xc7   :  { %v2528_v56 = vcombine.high %v2512_v32, %v2512_v32 }
  0xcb   :  { %3607 = vmatmul.mubr.bf16.vlgmr.msra.gmra.mrb[0].mxu1 %v447_v14  ;;  %v1894_v14 = vcombine.high %v224_v43, %v224_v43  ;;  %v518_v43 = vcombine.high %v496_v24, %v496_v24 }
  0xcc   :  { %3615 = vmatpush1.bf16.xpose.msra.mxu1 %v1890_v15  ;;  %3646 = vmatprep.mubr.bf16.mxu1 %v471_v16  ;;  %v1084_v15 = vrot.slane %v1068_v54, %v7572_v5  ;;  %v2527_v16 = vcombine.high %v2505_v1, %v2505_v1  ;;  %v225_v54 = vld [vmem:[#allocation6 + $0x28] sm:$0xff] }
  0xcd   :  { %3654 = vmatprep.subr.bf16.mxu1 %v1889_v19  ;;  %5567 = vmatmul.mubr.bf16.vlgmr.msra.gmra.mrb[0].mxu0 %v1057_v21  ;;  %v2526_v19 = vrot.slane %v2498_v13, %v7572_v5  ;;  %v1908_v21 = vrot.slane %v1894_v14, %v7572_v5  ;;  %v1950_v61 = vrot.slane %v225_v54, %v7572_v5 }
  0xce   :  { %5575 = vmatpush1.bf16.xpose.msra.mxu0 %v2463_v22  ;;  %5606 = vmatprep.mubr.bf16.mxu0 %v1056_v23  ;;  %v1075_v22 = vrot.slane %v1061_v18, %v7572_v5  ;;  %v1106_v31 = vcombine.high %v1084_v15, %v1084_v15 }
  0xcf   :  { %5614 = vmatprep.subr.bf16.mxu0 %v2481_v25  ;;  %v1910_v23 = vcombine.high %v1908_v21, %v1908_v21  ;;  %v1939_v25 = vcombine.high %v1917_v10, %v1917_v10 }
  0xd0   :  { %v1077_v27 = vcombine.high %v1075_v22, %v1075_v22  ;;  %v1091_v55 = vrot.slane %v1075_v22, %v7572_v5 }
  0xd1   :  { %v1938_v30 = vrot.slane %v1910_v23, %v7572_v5 }
  0xd2   :  { %v1105_v33 = vrot.slane %v1077_v27, %v7572_v5 }
  0xd3   :  { %v1942_v47 = vcombine.high %v1938_v30, %v1938_v30 }
  0xd4   :  { %v1109_v57 = vcombine.high %v1105_v33, %v1105_v33 }
  0xd7   :  { %3647 = vmatmul.mubr.bf16.vlgmr.msra.gmra.mrb[0].mxu1 %v469_v34  ;;  %v487_v34 = vrot.slane %v473_v29, %v7572_v5 }
  0xd8   :  { %3655 = vmatpush1.bf16.xpose.msra.mxu1 %v1875_v35  ;;  %3686 = vmatprep.mubr.bf16.mxu1 %v468_v36  ;;  %v2530_v35 = vcombine.high %v2526_v19, %v2526_v19  ;;  %v59_v36 = vld [vmem:[#allocation3 + $0x88] sm:$0xff] }
  0xd9   :  { %3694 = vmatprep.subr.bf16.mxu1 %v1893_v38  ;;  %5607 = vmatmul.mubr.bf16.vlgmr.msra.gmra.mrb[0].mxu0 %v1042_v44  ;;  %v237_v38 = vld [vmem:[#allocation6 + $0x88] sm:$0xff]  ;;  %v489_v39 = vcombine.high %v487_v34, %v487_v34  ;;  %v110_v40 = vmax.bf16 %v85_v37, %v59_v36  ;;  %v1924_v44 = vrot.slane %v1908_v21, %v7572_v5 }
  0xda   :  { %5615 = vmatpush1.bf16.xpose.msra.mxu0 %v2479_v45  ;;  %5646 = vmatprep.mubr.bf16.mxu0 %v1060_v46  ;;  %v2538_v41 = vrot.slane %v237_v38, %v7572_v5  ;;  %v503_v3 = vrot.slane %v487_v34, %v7572_v5 }
  0xdb   :  { %5654 = vmatprep.subr.bf16.mxu0 %v2519_v50  ;;  %v517_v45 = vrot.slane %v489_v39, %v7572_v5  ;;  %v161_v46 = vmax.bf16 %v136_v42, %v110_v40  ;;  %v187_v50 = vld [vmem:[#allocation3 + $0x2d4] sm:$0xff] }
  0xdc   :  { %v2546_v48 = vcombine.high %v2538_v41, %v2538_v41  ;;  %v519_v18 = vcombine.high %v503_v3, %v503_v3 }
  0xdd   :  { %v521_v6 = vcombine.high %v517_v45, %v517_v45 }
  0xe3   :  { %3687 = vmatmul.mubr.bf16.vlgmr.msra.gmra.mrb[0].mxu1 %v454_v58  ;;  %v212_v58 = vmax.bf16 %v187_v50, %v161_v46  ;;  %v86_v46 = vld [vmem:[#allocation3 + $0x154] sm:$0xff] }
  0xe4   :  { %3695 = vmatpush1.bf16.xpose.msra.mxu1 %v1891_v59  ;;  %3726 = vmatprep.mubr.bf16.mxu1 %v472_v60  ;;  %v98_v59 = vmax.bf16 %v73_v52, %v47_v51  ;;  %v2568_v60 = vrot.slane %v2546_v48, %v7572_v5  ;;  %v137_v52 = vld [vmem:[#allocation3 + $0x218] sm:$0xff] }
  0xe5   :  { %3734 = vmatprep.subr.bf16.mxu1 %v1931_v63  ;;  %5647 = vmatmul.mubr.bf16.vlgmr.msra.gmra.mrb[0].mxu0 %v1058_v0  ;;  %v1117_v63 = vrot.slane %v212_v58, %v7572_v5  ;;  %v1110_v29 = vcombine.high %v212_v58, %v212_v58 }
  0xe6   :  { %5655 = vmatpush1.bf16.xpose.msra.mxu0 %v2505_v1  ;;  %5686 = vmatprep.mubr.bf16.mxu0 %v1098_v2  ;;  %v149_v0 = vmax.bf16 %v124_v62, %v98_v59  ;;  %v1958_v1 = vcombine.high %v1950_v61, %v1950_v61  ;;  %v175_v2 = vld [vmem:[#allocation3 + $0x274] sm:$0xff]  ;;  %v2578_v14 = vcombine.high %v2568_v60, %v2568_v60 }
  0xe7   :  { %5694 = vmatprep.subr.bf16.mxu0 %v2529_v4  ;;  %v1940_v4 = vcombine.high %v1924_v44, %v1924_v44  ;;  %v1125_v7 = vcombine.high %v1117_v63, %v1117_v63  ;;  %v74_v62 = vld [vmem:[#allocation3 + $0xf4] sm:$0xff] }
  0xe8   :  { %v200_v8 = vmax.bf16 %v175_v2, %v149_v0 }
  0xea   :  { %v529_v13 = vrot.slane %v200_v8, %v7572_v5 }
  0xec   :  { %v545_v34 = vrot.slane %v529_v13, %v7572_v5 }
  0xef   :  { %3727 = vmatmul.mubr.bf16.vlgmr.msra.gmra.mrb[0].mxu1 %v470_v9  ;;  %v1980_v9 = vrot.slane %v1958_v1, %v7572_v5 }
  0xf0   :  { %3735 = vmatpush1.bf16.xpose.msra.mxu1 %v1917_v10  ;;  %3766 = vmatprep.mubr.bf16.mxu1 %v510_v11  ;;  %v1107_v10 = vcombine.high %v1091_v55, %v1091_v55  ;;  %v2554_v11 = vrot.slane %v2538_v41, %v7572_v5 }
  0xf1   :  { %3774 = vmatprep.subr.bf16.mxu1 %v1941_v12  ;;  %5687 = vmatmul.mubr.bf16.vlgmr.msra.gmra.mrb[0].mxu0 %v1084_v15  ;;  %v1147_v12 = vrot.slane %v1125_v7, %v7572_v5  ;;  %v2531_v15 = vcombine.high %v237_v38, %v237_v38  ;;  %v1990_v22 = vcombine.high %v1980_v9, %v1980_v9 }
  0xf2   :  { %5695 = vmatpush1.bf16.xpose.msra.mxu0 %v2527_v16  ;;  %5726 = vmatprep.mubr.bf16.mxu0 %v1108_v17  ;;  %v537_v16 = vcombine.high %v529_v13, %v529_v13  ;;  %v522_v38 = vcombine.high %v200_v8, %v200_v8  ;;  %v125_v8 = vld [vmem:[#allocation3 + $0x1b8] sm:$0xff] }
  0xf3   :  { %5734 = vmatprep.subr.bf16.mxu0 %v2526_v19  ;;  %v2545_v17 = vrot.slane %v2531_v15, %v7572_v5  ;;  %v1966_v19 = vrot.slane %v1950_v61, %v7572_v5  ;;  %v1157_v27 = vcombine.high %v1147_v12, %v1147_v12  ;;  %v48_v61 = vld [vmem:[#allocation3 + $0x30] sm:$0xff] }
  0xf4   :  { %v559_v21 = vrot.slane %v537_v16, %v7572_v5 }
  0xf5   :  { %v2547_v23 = vcombine.high %v2545_v17, %v2545_v17  ;;  %v2561_v41 = vrot.slane %v2545_v17, %v7572_v5 }
  0xf6   :  { %v569_v36 = vcombine.high %v559_v21, %v559_v21 }
  0xf7   :  { %v2577_v1 = vcombine.high %v2561_v41, %v2561_v41 }
  0xfb   :  { %3767 = vmatmul.mubr.bf16.vlgmr.msra.gmra.mrb[0].mxu1 %v496_v24  ;;  %v1943_v24 = vcombine.high %v225_v54, %v225_v54  ;;  %v567_v54 = vcombine.high %v545_v34, %v545_v34 }
  0xfc   :  { %3775 = vmatpush1.bf16.xpose.msra.mxu1 %v1939_v25  ;;  %3806 = vmatprep.mubr.bf16.mxu1 %v520_v26  ;;  %v1133_v25 = vrot.slane %v1117_v63, %v7572_v5  ;;  %v2576_v26 = vcombine.high %v2554_v11, %v2554_v11  ;;  %v226_v63 = vld [vmem:[#allocation6 + $0x30] sm:$0xff] }
  0xfd   :  { %3814 = vmatprep.subr.bf16.mxu1 %v1938_v30  ;;  %5727 = vmatmul.mubr.bf16.vlgmr.msra.gmra.mrb[0].mxu0 %v1106_v31  ;;  %v2575_v30 = vrot.slane %v2547_v23, %v7572_v5  ;;  %v1957_v31 = vrot.slane %v1943_v24, %v7572_v5  ;;  %v1999_v7 = vrot.slane %v226_v63, %v7572_v5 }
  0xfe   :  { %5735 = vmatpush1.bf16.xpose.msra.mxu0 %v2512_v32  ;;  %5766 = vmatprep.mubr.bf16.mxu0 %v1105_v33  ;;  %v1124_v32 = vrot.slane %v1110_v29, %v7572_v5  ;;  %v1155_v40 = vcombine.high %v1133_v25, %v1133_v25 }
  0xff   :  { %5774 = vmatprep.subr.bf16.mxu0 %v2530_v35  ;;  %v1959_v33 = vcombine.high %v1957_v31, %v1957_v31  ;;  %v1988_v35 = vcombine.high %v1966_v19, %v1966_v19 }
 0x100   :  { %v1126_v37 = vcombine.high %v1124_v32, %v1124_v32  ;;  %v1140_v0 = vrot.slane %v1124_v32, %v7572_v5 }
 0x101   :  { %v1987_v39 = vrot.slane %v1959_v33, %v7572_v5 }
 0x102   :  { %v1154_v42 = vrot.slane %v1126_v37, %v7572_v5 }
 0x103   :  { %v1991_v58 = vcombine.high %v1987_v39, %v1987_v39 }
 0x104   :  { %v1158_v2 = vcombine.high %v1154_v42, %v1154_v42 }
 0x107   :  { %3807 = vmatmul.mubr.bf16.vlgmr.msra.gmra.mrb[0].mxu1 %v518_v43  ;;  %v536_v43 = vrot.slane %v522_v38, %v7572_v5 }
 0x108   :  { %3815 = vmatpush1.bf16.xpose.msra.mxu1 %v1924_v44  ;;  %3846 = vmatprep.mubr.bf16.mxu1 %v517_v45  ;;  %v2579_v44 = vcombine.high %v2575_v30, %v2575_v30  ;;  %v60_v45 = vld [vmem:[#allocation3 + $0x90] sm:$0xff] }
 0x109   :  { %3854 = vmatprep.subr.bf16.mxu1 %v1942_v47  ;;  %5767 = vmatmul.mubr.bf16.vlgmr.msra.gmra.mrb[0].mxu0 %v1091_v55  ;;  %v238_v47 = vld [vmem:[#allocation6 + $0x90] sm:$0xff]  ;;  %v538_v48 = vcombine.high %v536_v43, %v536_v43  ;;  %v111_v50 = vmax.bf16 %v86_v46, %v60_v45  ;;  %v1973_v55 = vrot.slane %v1957_v31, %v7572_v5 }
 0x10a   :  { %5775 = vmatpush1.bf16.xpose.msra.mxu0 %v2528_v56  ;;  %5806 = vmatprep.mubr.bf16.mxu0 %v1109_v57  ;;  %v2587_v51 = vrot.slane %v238_v47, %v7572_v5  ;;  %v552_v13 = vrot.slane %v536_v43, %v7572_v5 }
 0x10b   :  { %5814 = vmatprep.subr.bf16.mxu0 %v2568_v60  ;;  %v566_v56 = vrot.slane %v538_v48, %v7572_v5  ;;  %v162_v57 = vmax.bf16 %v137_v52, %v111_v50  ;;  %v188_v60 = vld [vmem:[#allocation3 + $0x2dc] sm:$0xff] }
 0x10c   :  { %v2595_v59 = vcombine.high %v2587_v51, %v2587_v51  ;;  %v568_v29 = vcombine.high %v552_v13, %v552_v13 }
 0x10d   :  { %v570_v15 = vcombine.high %v566_v56, %v566_v56 }
 0x113   :  { %3847 = vmatmul.mubr.bf16.vlgmr.msra.gmra.mrb[0].mxu1 %v503_v3  ;;  %v213_v3 = vmax.bf16 %v188_v60, %v162_v57  ;;  %v87_v57 = vld [vmem:[#allocation3 + $0x15c] sm:$0xff] }
 0x114   :  { %3855 = vmatpush1.bf16.xpose.msra.mxu1 %v1940_v4  ;;  %3886 = vmatprep.mubr.bf16.mxu1 %v521_v6  ;;  %v99_v4 = vmax.bf16 %v74_v62, %v48_v61  ;;  %v2617_v6 = vrot.slane %v2595_v59, %v7572_v5  ;;  %v138_v62 = vld [vmem:[#allocation3 + $0x220] sm:$0xff] }
 0x115   :  { %3894 = vmatprep.subr.bf16.mxu1 %v1980_v9  ;;  %5807 = vmatmul.mubr.bf16.vlgmr.msra.gmra.mrb[0].mxu0 %v1107_v10  ;;  %v1166_v9 = vrot.slane %v213_v3, %v7572_v5  ;;  %v1159_v38 = vcombine.high %v213_v3, %v213_v3 }
 0x116   :  { %5815 = vmatpush1.bf16.xpose.msra.mxu0 %v2554_v11  ;;  %5846 = vmatprep.mubr.bf16.mxu0 %v1147_v12  ;;  %v150_v10 = vmax.bf16 %v125_v8, %v99_v4  ;;  %v2007_v11 = vcombine.high %v1999_v7, %v1999_v7  ;;  %v176_v12 = vld [vmem:[#allocation3 + $0x27c] sm:$0xff]  ;;  %v2627_v24 = vcombine.high %v2617_v6, %v2617_v6 }
 0x117   :  { %5854 = vmatprep.subr.bf16.mxu0 %v2578_v14  ;;  %v1989_v14 = vcombine.high %v1973_v55, %v1973_v55  ;;  %v1174_v16 = vcombine.high %v1166_v9, %v1166_v9  ;;  %v75_v8 = vld [vmem:[#allocation3 + $0xfc] sm:$0xff] }
 0x118   :  { %v201_v17 = vmax.bf16 %v176_v12, %v150_v10 }
 0x11a   :  { %v578_v23 = vrot.slane %v201_v17, %v7572_v5 }
 0x11c   :  { %v594_v43 = vrot.slane %v578_v23, %v7572_v5 }
 0x11f   :  { %3887 = vmatmul.mubr.bf16.vlgmr.msra.gmra.mrb[0].mxu1 %v519_v18  ;;  %v2029_v18 = vrot.slane %v2007_v11, %v7572_v5 }
 0x120   :  { %3895 = vmatpush1.bf16.xpose.msra.mxu1 %v1966_v19  ;;  %3926 = vmatprep.mubr.bf16.mxu1 %v559_v21  ;;  %v1156_v19 = vcombine.high %v1140_v0, %v1140_v0  ;;  %v2603_v21 = vrot.slane %v2587_v51, %v7572_v5 }
 0x121   :  { %3934 = vmatprep.subr.bf16.mxu1 %v1990_v22  ;;  %5847 = vmatmul.mubr.bf16.vlgmr.msra.gmra.mrb[0].mxu0 %v1133_v25  ;;  %v1196_v22 = vrot.slane %v1174_v16, %v7572_v5  ;;  %v2580_v25 = vcombine.high %v238_v47, %v238_v47  ;;  %v2039_v32 = vcombine.high %v2029_v18, %v2029_v18 }
 0x122   :  { %5855 = vmatpush1.bf16.xpose.msra.mxu0 %v2576_v26  ;;  %5886 = vmatprep.mubr.bf16.mxu0 %v1157_v27  ;;  %v586_v26 = vcombine.high %v578_v23, %v578_v23  ;;  %v571_v47 = vcombine.high %v201_v17, %v201_v17  ;;  %v126_v17 = vld [vmem:[#allocation3 + $0x1c0] sm:$0xff] }
 0x123   :  { %5894 = vmatprep.subr.bf16.mxu0 %v2575_v30  ;;  %v2594_v27 = vrot.slane %v2580_v25, %v7572_v5  ;;  %v2015_v30 = vrot.slane %v1999_v7, %v7572_v5  ;;  %v1206_v37 = vcombine.high %v1196_v22, %v1196_v22  ;;  %v49_v7 = vld [vmem:[#allocation3 + $0x38] sm:$0xff] }
 0x124   :  { %v608_v31 = vrot.slane %v586_v26, %v7572_v5 }
 0x125   :  { %v2596_v33 = vcombine.high %v2594_v27, %v2594_v27  ;;  %v2610_v51 = vrot.slane %v2594_v27, %v7572_v5 }
 0x126   :  { %v618_v45 = vcombine.high %v608_v31, %v608_v31 }
 0x127   :  { %v2626_v11 = vcombine.high %v2610_v51, %v2610_v51 }
 0x12b   :  { %3927 = vmatmul.mubr.bf16.vlgmr.msra.gmra.mrb[0].mxu1 %v545_v34  ;;  %v1992_v34 = vcombine.high %v226_v63, %v226_v63  ;;  %v616_v63 = vcombine.high %v594_v43, %v594_v43 }
 0x12c   :  { %3935 = vmatpush1.bf16.xpose.msra.mxu1 %v1988_v35  ;;  %3966 = vmatprep.mubr.bf16.mxu1 %v569_v36  ;;  %v1182_v35 = vrot.slane %v1166_v9, %v7572_v5  ;;  %v2625_v36 = vcombine.high %v2603_v21, %v2603_v21  ;;  %v227_v9 = vld [vmem:[#allocation6 + $0x38] sm:$0xff] }
 0x12d   :  { %3974 = vmatprep.subr.bf16.mxu1 %v1987_v39  ;;  %5887 = vmatmul.mubr.bf16.vlgmr.msra.gmra.mrb[0].mxu0 %v1155_v40  ;;  %v2624_v39 = vrot.slane %v2596_v33, %v7572_v5  ;;  %v2006_v40 = vrot.slane %v1992_v34, %v7572_v5  ;;  %v2048_v16 = vrot.slane %v227_v9, %v7572_v5 }
 0x12e   :  { %5895 = vmatpush1.bf16.xpose.msra.mxu0 %v2561_v41  ;;  %5926 = vmatprep.mubr.bf16.mxu0 %v1154_v42  ;;  %v1173_v41 = vrot.slane %v1159_v38, %v7572_v5  ;;  %v1204_v50 = vcombine.high %v1182_v35, %v1182_v35 }
 0x12f   :  { %5934 = vmatprep.subr.bf16.mxu0 %v2579_v44  ;;  %v2008_v42 = vcombine.high %v2006_v40, %v2006_v40  ;;  %v2037_v44 = vcombine.high %v2015_v30, %v2015_v30 }
 0x130   :  { %v1175_v46 = vcombine.high %v1173_v41, %v1173_v41  ;;  %v1189_v10 = vrot.slane %v1173_v41, %v7572_v5 }
 0x131   :  { %v2036_v48 = vrot.slane %v2008_v42, %v7572_v5 }
 0x132   :  { %v1203_v52 = vrot.slane %v1175_v46, %v7572_v5 }
 0x133   :  { %v2040_v3 = vcombine.high %v2036_v48, %v2036_v48 }
 0x134   :  { %v1207_v12 = vcombine.high %v1203_v52, %v1203_v52 }
 0x137   :  { %3967 = vmatmul.mubr.bf16.vlgmr.msra.gmra.mrb[0].mxu1 %v567_v54  ;;  %v585_v54 = vrot.slane %v571_v47, %v7572_v5 }
 0x138   :  { %3975 = vmatpush1.bf16.xpose.msra.mxu1 %v1973_v55  ;;  %4006 = vmatprep.mubr.bf16.mxu1 %v566_v56  ;;  %v2628_v55 = vcombine.high %v2624_v39, %v2624_v39  ;;  %v61_v56 = vld [vmem:[#allocation3 + $0x98] sm:$0xff] }
 0x139   :  { %4014 = vmatprep.subr.bf16.mxu1 %v1991_v58  ;;  %5927 = vmatmul.mubr.bf16.vlgmr.msra.gmra.mrb[0].mxu0 %v1140_v0  ;;  %v239_v58 = vld [vmem:[#allocation6 + $0x98] sm:$0xff]  ;;  %v587_v59 = vcombine.high %v585_v54, %v585_v54  ;;  %v112_v60 = vmax.bf16 %v87_v57, %v61_v56  ;;  %v2022_v0 = vrot.slane %v2006_v40, %v7572_v5 }
 0x13a   :  { %5935 = vmatpush1.bf16.xpose.msra.mxu0 %v2577_v1  ;;  %5966 = vmatprep.mubr.bf16.mxu0 %v1158_v2  ;;  %v2636_v61 = vrot.slane %v239_v58, %v7572_v5  ;;  %v601_v23 = vrot.slane %v585_v54, %v7572_v5 }
 0x13b   :  { %5974 = vmatprep.subr.bf16.mxu0 %v2617_v6  ;;  %v615_v1 = vrot.slane %v587_v59, %v7572_v5  ;;  %v163_v2 = vmax.bf16 %v138_v62, %v112_v60  ;;  %v189_v6 = vld [vmem:[#allocation3 + $0x2e4] sm:$0xff] }
 0x13c   :  { %v2644_v4 = vcombine.high %v2636_v61, %v2636_v61  ;;  %v617_v38 = vcombine.high %v601_v23, %v601_v23 }
 0x13d   :  { %v619_v25 = vcombine.high %v615_v1, %v615_v1 }
 0x143   :  { %4007 = vmatmul.mubr.bf16.vlgmr.msra.gmra.mrb[0].mxu1 %v552_v13  ;;  %v214_v13 = vmax.bf16 %v189_v6, %v163_v2  ;;  %v88_v2 = vld [vmem:[#allocation3 + $0x164] sm:$0xff] }
 0x144   :  { %4015 = vmatpush1.bf16.xpose.msra.mxu1 %v1989_v14  ;;  %4046 = vmatprep.mubr.bf16.mxu1 %v570_v15  ;;  %v100_v14 = vmax.bf16 %v75_v8, %v49_v7  ;;  %v2666_v15 = vrot.slane %v2644_v4, %v7572_v5  ;;  %v139_v8 = vld [vmem:[#allocation3 + $0x228] sm:$0xff] }
 0x145   :  { %4054 = vmatprep.subr.bf16.mxu1 %v2029_v18  ;;  %5967 = vmatmul.mubr.bf16.vlgmr.msra.gmra.mrb[0].mxu0 %v1156_v19  ;;  %v1215_v18 = vrot.slane %v214_v13, %v7572_v5  ;;  %v1208_v47 = vcombine.high %v214_v13, %v214_v13 }
 0x146   :  { %5975 = vmatpush1.bf16.xpose.msra.mxu0 %v2603_v21  ;;  %6006 = vmatprep.mubr.bf16.mxu0 %v1196_v22  ;;  %v151_v19 = vmax.bf16 %v126_v17, %v100_v14  ;;  %v2056_v21 = vcombine.high %v2048_v16, %v2048_v16  ;;  %v177_v22 = vld [vmem:[#allocation3 + $0x284] sm:$0xff]  ;;  %v2676_v34 = vcombine.high %v2666_v15, %v2666_v15 }
 0x147   :  { %6014 = vmatprep.subr.bf16.mxu0 %v2627_v24  ;;  %v2038_v24 = vcombine.high %v2022_v0, %v2022_v0  ;;  %v1223_v26 = vcombine.high %v1215_v18, %v1215_v18  ;;  %v76_v17 = vld [vmem:[#allocation3 + $0x104] sm:$0xff] }
 0x148   :  { %v202_v27 = vmax.bf16 %v177_v22, %v151_v19 }
 0x14a   :  { %v627_v33 = vrot.slane %v202_v27, %v7572_v5 }
 0x14c   :  { %v643_v54 = vrot.slane %v627_v33, %v7572_v5 }
 0x14f   :  { %4047 = vmatmul.mubr.bf16.vlgmr.msra.gmra.mrb[0].mxu1 %v568_v29  ;;  %v2078_v29 = vrot.slane %v2056_v21, %v7572_v5 }
 0x150   :  { %4055 = vmatpush1.bf16.xpose.msra.mxu1 %v2015_v30  ;;  %4086 = vmatprep.mubr.bf16.mxu1 %v608_v31  ;;  %v1205_v30 = vcombine.high %v1189_v10, %v1189_v10  ;;  %v2652_v31 = vrot.slane %v2636_v61, %v7572_v5 }
 0x151   :  { %4094 = vmatprep.subr.bf16.mxu1 %v2039_v32  ;;  %6007 = vmatmul.mubr.bf16.vlgmr.msra.gmra.mrb[0].mxu0 %v1182_v35  ;;  %v1245_v32 = vrot.slane %v1223_v26, %v7572_v5  ;;  %v2629_v35 = vcombine.high %v239_v58, %v239_v58  ;;  %v2088_v41 = vcombine.high %v2078_v29, %v2078_v29 }
 0x152   :  { %6015 = vmatpush1.bf16.xpose.msra.mxu0 %v2625_v36  ;;  %6046 = vmatprep.mubr.bf16.mxu0 %v1206_v37  ;;  %v635_v36 = vcombine.high %v627_v33, %v627_v33  ;;  %v620_v58 = vcombine.high %v202_v27, %v202_v27  ;;  %v127_v27 = vld [vmem:[#allocation3 + $0x1c8] sm:$0xff] }
 0x153   :  { %6054 = vmatprep.subr.bf16.mxu0 %v2624_v39  ;;  %v2643_v37 = vrot.slane %v2629_v35, %v7572_v5  ;;  %v2064_v39 = vrot.slane %v2048_v16, %v7572_v5  ;;  %v1255_v46 = vcombine.high %v1245_v32, %v1245_v32  ;;  %v50_v16 = vld [vmem:[#allocation3 + $0x40] sm:$0xff] }
 0x154   :  { %v657_v40 = vrot.slane %v635_v36, %v7572_v5 }
 0x155   :  { %v2645_v42 = vcombine.high %v2643_v37, %v2643_v37  ;;  %v2659_v61 = vrot.slane %v2643_v37, %v7572_v5 }
 0x156   :  { %v667_v56 = vcombine.high %v657_v40, %v657_v40 }
 0x157   :  { %v2675_v21 = vcombine.high %v2659_v61, %v2659_v61 }
 0x15b   :  { %4087 = vmatmul.mubr.bf16.vlgmr.msra.gmra.mrb[0].mxu1 %v594_v43  ;;  %v2041_v43 = vcombine.high %v227_v9, %v227_v9  ;;  %v665_v9 = vcombine.high %v643_v54, %v643_v54 }
 0x15c   :  { %4095 = vmatpush1.bf16.xpose.msra.mxu1 %v2037_v44  ;;  %4126 = vmatprep.mubr.bf16.mxu1 %v618_v45  ;;  %v1231_v44 = vrot.slane %v1215_v18, %v7572_v5  ;;  %v2674_v45 = vcombine.high %v2652_v31, %v2652_v31  ;;  %v228_v18 = vld [vmem:[#allocation6 + $0x40] sm:$0xff] }
 0x15d   :  { %4134 = vmatprep.subr.bf16.mxu1 %v2036_v48  ;;  %6047 = vmatmul.mubr.bf16.vlgmr.msra.gmra.mrb[0].mxu0 %v1204_v50  ;;  %v2673_v48 = vrot.slane %v2645_v42, %v7572_v5  ;;  %v2055_v50 = vrot.slane %v2041_v43, %v7572_v5  ;;  %v2097_v26 = vrot.slane %v228_v18, %v7572_v5 }
 0x15e   :  { %6055 = vmatpush1.bf16.xpose.msra.mxu0 %v2610_v51  ;;  %6086 = vmatprep.mubr.bf16.mxu0 %v1203_v52  ;;  %v1222_v51 = vrot.slane %v1208_v47, %v7572_v5  ;;  %v1253_v60 = vcombine.high %v1231_v44, %v1231_v44 }
 0x15f   :  { %6094 = vmatprep.subr.bf16.mxu0 %v2628_v55  ;;  %v2057_v52 = vcombine.high %v2055_v50, %v2055_v50  ;;  %v2086_v55 = vcombine.high %v2064_v39, %v2064_v39 }
 0x160   :  { %v1224_v57 = vcombine.high %v1222_v51, %v1222_v51  ;;  %v1238_v19 = vrot.slane %v1222_v51, %v7572_v5 }
 0x161   :  { %v2085_v59 = vrot.slane %v2057_v52, %v7572_v5 }
 0x162   :  { %v1252_v62 = vrot.slane %v1224_v57, %v7572_v5 }
 0x163   :  { %v2089_v13 = vcombine.high %v2085_v59, %v2085_v59 }
 0x164   :  { %v1256_v22 = vcombine.high %v1252_v62, %v1252_v62 }
 0x167   :  { %4127 = vmatmul.mubr.bf16.vlgmr.msra.gmra.mrb[0].mxu1 %v616_v63  ;;  %v634_v63 = vrot.slane %v620_v58, %v7572_v5 }
 0x168   :  { %4135 = vmatpush1.bf16.xpose.msra.mxu1 %v2022_v0  ;;  %4166 = vmatprep.mubr.bf16.mxu1 %v615_v1  ;;  %v2677_v0 = vcombine.high %v2673_v48, %v2673_v48  ;;  %v62_v1 = vld [vmem:[#allocation3 + $0xa0] sm:$0xff] }
 0x169   :  { %4174 = vmatprep.subr.bf16.mxu1 %v2040_v3  ;;  %6087 = vmatmul.mubr.bf16.vlgmr.msra.gmra.mrb[0].mxu0 %v1189_v10  ;;  %v240_v3 = vld [vmem:[#allocation6 + $0xa0] sm:$0xff]  ;;  %v636_v4 = vcombine.high %v634_v63, %v634_v63  ;;  %v113_v6 = vmax.bf16 %v88_v2, %v62_v1  ;;  %v2071_v10 = vrot.slane %v2055_v50, %v7572_v5 }
 0x16a   :  { %6095 = vmatpush1.bf16.xpose.msra.mxu0 %v2626_v11  ;;  %6126 = vmatprep.mubr.bf16.mxu0 %v1207_v12  ;;  %v2685_v7 = vrot.slane %v240_v3, %v7572_v5  ;;  %v650_v33 = vrot.slane %v634_v63, %v7572_v5 }
 0x16b   :  { %6134 = vmatprep.subr.bf16.mxu0 %v2666_v15  ;;  %v664_v11 = vrot.slane %v636_v4, %v7572_v5  ;;  %v164_v12 = vmax.bf16 %v139_v8, %v113_v6  ;;  %v190_v15 = vld [vmem:[#allocation3 + $0x2ec] sm:$0xff] }
 0x16c   :  { %v2693_v14 = vcombine.high %v2685_v7, %v2685_v7  ;;  %v666_v47 = vcombine.high %v650_v33, %v650_v33 }
 0x16d   :  { %v668_v35 = vcombine.high %v664_v11, %v664_v11 }
 0x173   :  { %4167 = vmatmul.mubr.bf16.vlgmr.msra.gmra.mrb[0].mxu1 %v601_v23  ;;  %v215_v23 = vmax.bf16 %v190_v15, %v164_v12  ;;  %v89_v12 = vld [vmem:[#allocation3 + $0x16c] sm:$0xff] }
 0x174   :  { %4175 = vmatpush1.bf16.xpose.msra.mxu1 %v2038_v24  ;;  %4206 = vmatprep.mubr.bf16.mxu1 %v619_v25  ;;  %v101_v24 = vmax.bf16 %v76_v17, %v50_v16  ;;  %v2715_v25 = vrot.slane %v2693_v14, %v7572_v5  ;;  %v140_v17 = vld [vmem:[#allocation3 + $0x230] sm:$0xff] }
 0x175   :  { %4214 = vmatprep.subr.bf16.mxu1 %v2078_v29  ;;  %6127 = vmatmul.mubr.bf16.vlgmr.msra.gmra.mrb[0].mxu0 %v1205_v30  ;;  %v1264_v29 = vrot.slane %v215_v23, %v7572_v5  ;;  %v1257_v58 = vcombine.high %v215_v23, %v215_v23 }
 0x176   :  { %6135 = vmatpush1.bf16.xpose.msra.mxu0 %v2652_v31  ;;  %6166 = vmatprep.mubr.bf16.mxu0 %v1245_v32  ;;  %v152_v30 = vmax.bf16 %v127_v27, %v101_v24  ;;  %v2105_v31 = vcombine.high %v2097_v26, %v2097_v26  ;;  %v178_v32 = vld [vmem:[#allocation3 + $0x28c] sm:$0xff]  ;;  %v2725_v43 = vcombine.high %v2715_v25, %v2715_v25 }
 0x177   :  { %6174 = vmatprep.subr.bf16.mxu0 %v2676_v34  ;;  %v2087_v34 = vcombine.high %v2071_v10, %v2071_v10  ;;  %v1272_v36 = vcombine.high %v1264_v29, %v1264_v29  ;;  %v77_v27 = vld [vmem:[#allocation3 + $0x10c] sm:$0xff] }
 0x178   :  { %v203_v37 = vmax.bf16 %v178_v32, %v152_v30 }
 0x17a   :  { %v676_v42 = vrot.slane %v203_v37, %v7572_v5 }
 0x17c   :  { %v692_v63 = vrot.slane %v676_v42, %v7572_v5 }
 0x17f   :  { %4207 = vmatmul.mubr.bf16.vlgmr.msra.gmra.mrb[0].mxu1 %v617_v38  ;;  %v2127_v38 = vrot.slane %v2105_v31, %v7572_v5 }
 0x180   :  { %4215 = vmatpush1.bf16.xpose.msra.mxu1 %v2064_v39  ;;  %4246 = vmatprep.mubr.bf16.mxu1 %v657_v40  ;;  %v1254_v39 = vcombine.high %v1238_v19, %v1238_v19  ;;  %v2701_v40 = vrot.slane %v2685_v7, %v7572_v5 }
 0x181   :  { %4254 = vmatprep.subr.bf16.mxu1 %v2088_v41  ;;  %6167 = vmatmul.mubr.bf16.vlgmr.msra.gmra.mrb[0].mxu0 %v1231_v44  ;;  %v1294_v41 = vrot.slane %v1272_v36, %v7572_v5  ;;  %v2678_v44 = vcombine.high %v240_v3, %v240_v3  ;;  %v2137_v51 = vcombine.high %v2127_v38, %v2127_v38 }
 0x182   :  { %6175 = vmatpush1.bf16.xpose.msra.mxu0 %v2674_v45  ;;  %6206 = vmatprep.mubr.bf16.mxu0 %v1255_v46  ;;  %v684_v45 = vcombine.high %v676_v42, %v676_v42  ;;  %v669_v3 = vcombine.high %v203_v37, %v203_v37  ;;  %v128_v37 = vld [vmem:[#allocation3 + $0x1d0] sm:$0xff] }
 0x183   :  { %6214 = vmatprep.subr.bf16.mxu0 %v2673_v48  ;;  %v2692_v46 = vrot.slane %v2678_v44, %v7572_v5  ;;  %v2113_v48 = vrot.slane %v2097_v26, %v7572_v5  ;;  %v1304_v57 = vcombine.high %v1294_v41, %v1294_v41  ;;  %v51_v26 = vld [vmem:[#allocation3 + $0x48] sm:$0xff] }
 0x184   :  { %v706_v50 = vrot.slane %v684_v45, %v7572_v5 }
 0x185   :  { %v2694_v52 = vcombine.high %v2692_v46, %v2692_v46  ;;  %v2708_v7 = vrot.slane %v2692_v46, %v7572_v5 }
 0x186   :  { %v716_v1 = vcombine.high %v706_v50, %v706_v50 }
 0x187   :  { %v2724_v31 = vcombine.high %v2708_v7, %v2708_v7 }
 0x18b   :  { %4247 = vmatmul.mubr.bf16.vlgmr.msra.gmra.mrb[0].mxu1 %v643_v54  ;;  %v2090_v54 = vcombine.high %v228_v18, %v228_v18  ;;  %v714_v18 = vcombine.high %v692_v63, %v692_v63 }
 0x18c   :  { %4255 = vmatpush1.bf16.xpose.msra.mxu1 %v2086_v55  ;;  %4286 = vmatprep.mubr.bf16.mxu1 %v667_v56  ;;  %v1280_v55 = vrot.slane %v1264_v29, %v7572_v5  ;;  %v2723_v56 = vcombine.high %v2701_v40, %v2701_v40  ;;  %v229_v29 = vld [vmem:[#allocation6 + $0x48] sm:$0xff] }
 0x18d   :  { %4294 = vmatprep.subr.bf16.mxu1 %v2085_v59  ;;  %6207 = vmatmul.mubr.bf16.vlgmr.msra.gmra.mrb[0].mxu0 %v1253_v60  ;;  %v2722_v59 = vrot.slane %v2694_v52, %v7572_v5  ;;  %v2104_v60 = vrot.slane %v2090_v54, %v7572_v5  ;;  %v2146_v36 = vrot.slane %v229_v29, %v7572_v5 }
 0x18e   :  { %6215 = vmatpush1.bf16.xpose.msra.mxu0 %v2659_v61  ;;  %6246 = vmatprep.mubr.bf16.mxu0 %v1252_v62  ;;  %v1271_v61 = vrot.slane %v1257_v58, %v7572_v5  ;;  %v1302_v6 = vcombine.high %v1280_v55, %v1280_v55 }
 0x18f   :  { %6254 = vmatprep.subr.bf16.mxu0 %v2677_v0  ;;  %v2106_v62 = vcombine.high %v2104_v60, %v2104_v60  ;;  %v2135_v0 = vcombine.high %v2113_v48, %v2113_v48 }
 0x190   :  { %v1273_v2 = vcombine.high %v1271_v61, %v1271_v61  ;;  %v1287_v30 = vrot.slane %v1271_v61, %v7572_v5 }
 0x191   :  { %v2134_v4 = vrot.slane %v2106_v62, %v7572_v5 }
 0x192   :  { %v1301_v8 = vrot.slane %v1273_v2, %v7572_v5 }
 0x193   :  { %v2138_v23 = vcombine.high %v2134_v4, %v2134_v4 }
 0x194   :  { %v1305_v32 = vcombine.high %v1301_v8, %v1301_v8 }
 0x197   :  { %4287 = vmatmul.mubr.bf16.vlgmr.msra.gmra.mrb[0].mxu1 %v665_v9  ;;  %v683_v9 = vrot.slane %v669_v3, %v7572_v5 }
 0x198   :  { %4295 = vmatpush1.bf16.xpose.msra.mxu1 %v2071_v10  ;;  %4326 = vmatprep.mubr.bf16.mxu1 %v664_v11  ;;  %v2726_v10 = vcombine.high %v2722_v59, %v2722_v59  ;;  %v63_v11 = vld [vmem:[#allocation3 + $0xa8] sm:$0xff] }
 0x199   :  { %4334 = vmatprep.subr.bf16.mxu1 %v2089_v13  ;;  %6247 = vmatmul.mubr.bf16.vlgmr.msra.gmra.mrb[0].mxu0 %v1238_v19  ;;  %v241_v13 = vld [vmem:[#allocation6 + $0xa8] sm:$0xff]  ;;  %v685_v14 = vcombine.high %v683_v9, %v683_v9  ;;  %v114_v15 = vmax.bf16 %v89_v12, %v63_v11  ;;  %v2120_v19 = vrot.slane %v2104_v60, %v7572_v5 }
 0x19a   :  { %6255 = vmatpush1.bf16.xpose.msra.mxu0 %v2675_v21  ;;  %6286 = vmatprep.mubr.bf16.mxu0 %v1256_v22  ;;  %v2734_v16 = vrot.slane %v241_v13, %v7572_v5  ;;  %v699_v42 = vrot.slane %v683_v9, %v7572_v5 }
 0x19b   :  { %6294 = vmatprep.subr.bf16.mxu0 %v2715_v25  ;;  %v713_v21 = vrot.slane %v685_v14, %v7572_v5  ;;  %v165_v22 = vmax.bf16 %v140_v17, %v114_v15  ;;  %v191_v25 = vld [vmem:[#allocation3 + $0x2f4] sm:$0xff] }
 0x19c   :  { %v2742_v24 = vcombine.high %v2734_v16, %v2734_v16  ;;  %v715_v58 = vcombine.high %v699_v42, %v699_v42 }
 0x19d   :  { %v717_v44 = vcombine.high %v713_v21, %v713_v21 }
 0x1a3   :  { %4327 = vmatmul.mubr.bf16.vlgmr.msra.gmra.mrb[0].mxu1 %v650_v33  ;;  %v216_v33 = vmax.bf16 %v191_v25, %v165_v22  ;;  %v90_v22 = vld [vmem:[#allocation3 + $0x174] sm:$0xff] }
 0x1a4   :  { %4335 = vmatpush1.bf16.xpose.msra.mxu1 %v2087_v34  ;;  %4366 = vmatprep.mubr.bf16.mxu1 %v668_v35  ;;  %v102_v34 = vmax.bf16 %v77_v27, %v51_v26  ;;  %v2764_v35 = vrot.slane %v2742_v24, %v7572_v5  ;;  %v141_v27 = vld [vmem:[#allocation3 + $0x238] sm:$0xff] }
 0x1a5   :  { %4374 = vmatprep.subr.bf16.mxu1 %v2127_v38  ;;  %6287 = vmatmul.mubr.bf16.vlgmr.msra.gmra.mrb[0].mxu0 %v1254_v39  ;;  %v1313_v38 = vrot.slane %v216_v33, %v7572_v5  ;;  %v1306_v3 = vcombine.high %v216_v33, %v216_v33 }
 0x1a6   :  { %6295 = vmatpush1.bf16.xpose.msra.mxu0 %v2701_v40  ;;  %6326 = vmatprep.mubr.bf16.mxu0 %v1294_v41  ;;  %v153_v39 = vmax.bf16 %v128_v37, %v102_v34  ;;  %v2154_v40 = vcombine.high %v2146_v36, %v2146_v36  ;;  %v179_v41 = vld [vmem:[#allocation3 + $0x294] sm:$0xff]  ;;  %v2774_v54 = vcombine.high %v2764_v35, %v2764_v35 }
 0x1a7   :  { %6334 = vmatprep.subr.bf16.mxu0 %v2725_v43  ;;  %v2136_v43 = vcombine.high %v2120_v19, %v2120_v19  ;;  %v1321_v45 = vcombine.high %v1313_v38, %v1313_v38  ;;  %v78_v37 = vld [vmem:[#allocation3 + $0x114] sm:$0xff] }
 0x1a8   :  { %v204_v46 = vmax.bf16 %v179_v41, %v153_v39 }
 0x1aa   :  { %v725_v52 = vrot.slane %v204_v46, %v7572_v5 }
 0x1ac   :  { %v741_v9 = vrot.slane %v725_v52, %v7572_v5 }
 0x1af   :  { %4367 = vmatmul.mubr.bf16.vlgmr.msra.gmra.mrb[0].mxu1 %v666_v47  ;;  %v2176_v47 = vrot.slane %v2154_v40, %v7572_v5 }
 0x1b0   :  { %4375 = vmatpush1.bf16.xpose.msra.mxu1 %v2113_v48  ;;  %4406 = vmatprep.mubr.bf16.mxu1 %v706_v50  ;;  %v1303_v48 = vcombine.high %v1287_v30, %v1287_v30  ;;  %v2750_v50 = vrot.slane %v2734_v16, %v7572_v5 }
 0x1b1   :  { %4414 = vmatprep.subr.bf16.mxu1 %v2137_v51  ;;  %6327 = vmatmul.mubr.bf16.vlgmr.msra.gmra.mrb[0].mxu0 %v1280_v55  ;;  %v1343_v51 = vrot.slane %v1321_v45, %v7572_v5  ;;  %v2727_v55 = vcombine.high %v241_v13, %v241_v13  ;;  %v2186_v61 = vcombine.high %v2176_v47, %v2176_v47 }
 0x1b2   :  { %6335 = vmatpush1.bf16.xpose.msra.mxu0 %v2723_v56  ;;  %6366 = vmatprep.mubr.bf16.mxu0 %v1304_v57  ;;  %v733_v56 = vcombine.high %v725_v52, %v725_v52  ;;  %v718_v13 = vcombine.high %v204_v46, %v204_v46  ;;  %v129_v46 = vld [vmem:[#allocation3 + $0x1d8] sm:$0xff] }
 0x1b3   :  { %6374 = vmatprep.subr.bf16.mxu0 %v2722_v59  ;;  %v2741_v57 = vrot.slane %v2727_v55, %v7572_v5  ;;  %v2162_v59 = vrot.slane %v2146_v36, %v7572_v5  ;;  %v1353_v2 = vcombine.high %v1343_v51, %v1343_v51  ;;  %v52_v36 = vld [vmem:[#allocation3 + $0x50] sm:$0xff] }
 0x1b4   :  { %v755_v60 = vrot.slane %v733_v56, %v7572_v5 }
 0x1b5   :  { %v2743_v62 = vcombine.high %v2741_v57, %v2741_v57  ;;  %v2757_v16 = vrot.slane %v2741_v57, %v7572_v5 }
 0x1b6   :  { %v765_v11 = vcombine.high %v755_v60, %v755_v60 }
 0x1b7   :  { %v2773_v40 = vcombine.high %v2757_v16, %v2757_v16 }
 0x1bb   :  { %4407 = vmatmul.mubr.bf16.vlgmr.msra.gmra.mrb[0].mxu1 %v692_v63  ;;  %v2139_v63 = vcombine.high %v229_v29, %v229_v29  ;;  %v763_v29 = vcombine.high %v741_v9, %v741_v9 }
 0x1bc   :  { %4415 = vmatpush1.bf16.xpose.msra.mxu1 %v2135_v0  ;;  %4446 = vmatprep.mubr.bf16.mxu1 %v716_v1  ;;  %v1329_v0 = vrot.slane %v1313_v38, %v7572_v5  ;;  %v2772_v1 = vcombine.high %v2750_v50, %v2750_v50  ;;  %v230_v38 = vld [vmem:[#allocation6 + $0x50] sm:$0xff] }
 0x1bd   :  { %4454 = vmatprep.subr.bf16.mxu1 %v2134_v4  ;;  %6367 = vmatmul.mubr.bf16.vlgmr.msra.gmra.mrb[0].mxu0 %v1302_v6  ;;  %v2771_v4 = vrot.slane %v2743_v62, %v7572_v5  ;;  %v2153_v6 = vrot.slane %v2139_v63, %v7572_v5  ;;  %v2195_v45 = vrot.slane %v230_v38, %v7572_v5 }
 0x1be   :  { %6375 = vmatpush1.bf16.xpose.msra.mxu0 %v2708_v7  ;;  %6406 = vmatprep.mubr.bf16.mxu0 %v1301_v8  ;;  %v1320_v7 = vrot.slane %v1306_v3, %v7572_v5  ;;  %v1351_v15 = vcombine.high %v1329_v0, %v1329_v0 }
 0x1bf   :  { %6414 = vmatprep.subr.bf16.mxu0 %v2726_v10  ;;  %v2155_v8 = vcombine.high %v2153_v6, %v2153_v6  ;;  %v2184_v10 = vcombine.high %v2162_v59, %v2162_v59 }
 0x1c0   :  { %v1322_v12 = vcombine.high %v1320_v7, %v1320_v7  ;;  %v1336_v39 = vrot.slane %v1320_v7, %v7572_v5 }
 0x1c1   :  { %v2183_v14 = vrot.slane %v2155_v8, %v7572_v5 }
 0x1c2   :  { %v1350_v17 = vrot.slane %v1322_v12, %v7572_v5 }
 0x1c3   :  { %v2187_v33 = vcombine.high %v2183_v14, %v2183_v14 }
 0x1c4   :  { %v1354_v41 = vcombine.high %v1350_v17, %v1350_v17 }
 0x1c7   :  { %4447 = vmatmul.mubr.bf16.vlgmr.msra.gmra.mrb[0].mxu1 %v714_v18  ;;  %v732_v18 = vrot.slane %v718_v13, %v7572_v5 }
 0x1c8   :  { %4455 = vmatpush1.bf16.xpose.msra.mxu1 %v2120_v19  ;;  %4486 = vmatprep.mubr.bf16.mxu1 %v713_v21  ;;  %v2775_v19 = vcombine.high %v2771_v4, %v2771_v4  ;;  %v64_v21 = vld [vmem:[#allocation3 + $0xb0] sm:$0xff] }
 0x1c9   :  { %4494 = vmatprep.subr.bf16.mxu1 %v2138_v23  ;;  %6407 = vmatmul.mubr.bf16.vlgmr.msra.gmra.mrb[0].mxu0 %v1287_v30  ;;  %v242_v23 = vld [vmem:[#allocation6 + $0xb0] sm:$0xff]  ;;  %v734_v24 = vcombine.high %v732_v18, %v732_v18  ;;  %v115_v25 = vmax.bf16 %v90_v22, %v64_v21  ;;  %v2169_v30 = vrot.slane %v2153_v6, %v7572_v5 }
 0x1ca   :  { %6415 = vmatpush1.bf16.xpose.msra.mxu0 %v2724_v31  ;;  %6446 = vmatprep.mubr.bf16.mxu0 %v1305_v32  ;;  %v2783_v26 = vrot.slane %v242_v23, %v7572_v5  ;;  %v748_v52 = vrot.slane %v732_v18, %v7572_v5 }
 0x1cb   :  { %6454 = vmatprep.subr.bf16.mxu0 %v2764_v35  ;;  %v762_v31 = vrot.slane %v734_v24, %v7572_v5  ;;  %v166_v32 = vmax.bf16 %v141_v27, %v115_v25  ;;  %v192_v35 = vld [vmem:[#allocation3 + $0x2fc] sm:$0xff] }
 0x1cc   :  { %v2791_v34 = vcombine.high %v2783_v26, %v2783_v26  ;;  %v764_v3 = vcombine.high %v748_v52, %v748_v52 }
 0x1cd   :  { %v766_v55 = vcombine.high %v762_v31, %v762_v31 }
 0x1d3   :  { %4487 = vmatmul.mubr.bf16.vlgmr.msra.gmra.mrb[0].mxu1 %v699_v42  ;;  %v217_v42 = vmax.bf16 %v192_v35, %v166_v32  ;;  %v91_v32 = vld [vmem:[#allocation3 + $0x17c] sm:$0xff] }
 0x1d4   :  { %4495 = vmatpush1.bf16.xpose.msra.mxu1 %v2136_v43  ;;  %4526 = vmatprep.mubr.bf16.mxu1 %v717_v44  ;;  %v103_v43 = vmax.bf16 %v78_v37, %v52_v36  ;;  %v2813_v44 = vrot.slane %v2791_v34, %v7572_v5  ;;  %v142_v37 = vld [vmem:[#allocation3 + $0x240] sm:$0xff] }
 0x1d5   :  { %4534 = vmatprep.subr.bf16.mxu1 %v2176_v47  ;;  %6447 = vmatmul.mubr.bf16.vlgmr.msra.gmra.mrb[0].mxu0 %v1303_v48  ;;  %v1362_v47 = vrot.slane %v217_v42, %v7572_v5  ;;  %v1355_v13 = vcombine.high %v217_v42, %v217_v42 }
 0x1d6   :  { %6455 = vmatpush1.bf16.xpose.msra.mxu0 %v2750_v50  ;;  %6486 = vmatprep.mubr.bf16.mxu0 %v1343_v51  ;;  %v154_v48 = vmax.bf16 %v129_v46, %v103_v43  ;;  %v2203_v50 = vcombine.high %v2195_v45, %v2195_v45  ;;  %v180_v51 = vld [vmem:[#allocation3 + $0x29c] sm:$0xff]  ;;  %v2823_v63 = vcombine.high %v2813_v44, %v2813_v44 }
 0x1d7   :  { %6494 = vmatprep.subr.bf16.mxu0 %v2774_v54  ;;  %v2185_v54 = vcombine.high %v2169_v30, %v2169_v30  ;;  %v1370_v56 = vcombine.high %v1362_v47, %v1362_v47  ;;  %v79_v46 = vld [vmem:[#allocation3 + $0x11c] sm:$0xff] }
 0x1d8   :  { %v205_v57 = vmax.bf16 %v180_v51, %v154_v48 }
 0x1da   :  { %v774_v62 = vrot.slane %v205_v57, %v7572_v5 }
 0x1dc   :  { %v790_v18 = vrot.slane %v774_v62, %v7572_v5 }
 0x1df   :  { %4527 = vmatmul.mubr.bf16.vlgmr.msra.gmra.mrb[0].mxu1 %v715_v58  ;;  %v2225_v58 = vrot.slane %v2203_v50, %v7572_v5 }
 0x1e0   :  { %4535 = vmatpush1.bf16.xpose.msra.mxu1 %v2162_v59  ;;  %4566 = vmatprep.mubr.bf16.mxu1 %v755_v60  ;;  %v1352_v59 = vcombine.high %v1336_v39, %v1336_v39  ;;  %v2799_v60 = vrot.slane %v2783_v26, %v7572_v5 }
 0x1e1   :  { %4574 = vmatprep.subr.bf16.mxu1 %v2186_v61  ;;  %6487 = vmatmul.mubr.bf16.vlgmr.msra.gmra.mrb[0].mxu0 %v1329_v0  ;;  %v1392_v61 = vrot.slane %v1370_v56, %v7572_v5  ;;  %v2776_v0 = vcombine.high %v242_v23, %v242_v23  ;;  %v2235_v7 = vcombine.high %v2225_v58, %v2225_v58 }
 0x1e2   :  { %6495 = vmatpush1.bf16.xpose.msra.mxu0 %v2772_v1  ;;  %6526 = vmatprep.mubr.bf16.mxu0 %v1353_v2  ;;  %v782_v1 = vcombine.high %v774_v62, %v774_v62  ;;  %v767_v23 = vcombine.high %v205_v57, %v205_v57  ;;  %v130_v57 = vld [vmem:[#allocation3 + $0x1e0] sm:$0xff] }
 0x1e3   :  { %6534 = vmatprep.subr.bf16.mxu0 %v2771_v4  ;;  %v2790_v2 = vrot.slane %v2776_v0, %v7572_v5  ;;  %v2211_v4 = vrot.slane %v2195_v45, %v7572_v5  ;;  %v1402_v12 = vcombine.high %v1392_v61, %v1392_v61  ;;  %v53_v45 = vld [vmem:[#allocation3 + $0x58] sm:$0xff] }
 0x1e4   :  { %v804_v6 = vrot.slane %v782_v1, %v7572_v5 }
 0x1e5   :  { %v2792_v8 = vcombine.high %v2790_v2, %v2790_v2  ;;  %v2806_v26 = vrot.slane %v2790_v2, %v7572_v5 }
 0x1e6   :  { %v814_v21 = vcombine.high %v804_v6, %v804_v6 }
 0x1e7   :  { %v2822_v50 = vcombine.high %v2806_v26, %v2806_v26 }
 0x1eb   :  { %4567 = vmatmul.mubr.bf16.vlgmr.msra.gmra.mrb[0].mxu1 %v741_v9  ;;  %v2188_v9 = vcombine.high %v230_v38, %v230_v38  ;;  %v812_v38 = vcombine.high %v790_v18, %v790_v18 }
 0x1ec   :  { %4575 = vmatpush1.bf16.xpose.msra.mxu1 %v2184_v10  ;;  %4606 = vmatprep.mubr.bf16.mxu1 %v765_v11  ;;  %v1378_v10 = vrot.slane %v1362_v47, %v7572_v5  ;;  %v2821_v11 = vcombine.high %v2799_v60, %v2799_v60  ;;  %v231_v47 = vld [vmem:[#allocation6 + $0x58] sm:$0xff] }
 0x1ed   :  { %4614 = vmatprep.subr.bf16.mxu1 %v2183_v14  ;;  %6527 = vmatmul.mubr.bf16.vlgmr.msra.gmra.mrb[0].mxu0 %v1351_v15  ;;  %v2820_v14 = vrot.slane %v2792_v8, %v7572_v5  ;;  %v2202_v15 = vrot.slane %v2188_v9, %v7572_v5  ;;  %v2244_v56 = vrot.slane %v231_v47, %v7572_v5 }
 0x1ee   :  { %6535 = vmatpush1.bf16.xpose.msra.mxu0 %v2757_v16  ;;  %6566 = vmatprep.mubr.bf16.mxu0 %v1350_v17  ;;  %v1369_v16 = vrot.slane %v1355_v13, %v7572_v5  ;;  %v1400_v25 = vcombine.high %v1378_v10, %v1378_v10 }
 0x1ef   :  { %6574 = vmatprep.subr.bf16.mxu0 %v2775_v19  ;;  %v2204_v17 = vcombine.high %v2202_v15, %v2202_v15  ;;  %v2233_v19 = vcombine.high %v2211_v4, %v2211_v4 }
 0x1f0   :  { %v1371_v22 = vcombine.high %v1369_v16, %v1369_v16  ;;  %v1385_v48 = vrot.slane %v1369_v16, %v7572_v5 }
 0x1f1   :  { %v2232_v24 = vrot.slane %v2204_v17, %v7572_v5 }
 0x1f2   :  { %v1399_v27 = vrot.slane %v1371_v22, %v7572_v5 }
 0x1f3   :  { %v2236_v42 = vcombine.high %v2232_v24, %v2232_v24 }
 0x1f4   :  { %v1403_v51 = vcombine.high %v1399_v27, %v1399_v27 }
 0x1f7   :  { %4607 = vmatmul.mubr.bf16.vlgmr.msra.gmra.mrb[0].mxu1 %v763_v29  ;;  %v781_v29 = vrot.slane %v767_v23, %v7572_v5 }
 0x1f8   :  { %4615 = vmatpush1.bf16.xpose.msra.mxu1 %v2169_v30  ;;  %4646 = vmatprep.mubr.bf16.mxu1 %v762_v31  ;;  %v2824_v30 = vcombine.high %v2820_v14, %v2820_v14  ;;  %v65_v31 = vld [vmem:[#allocation3 + $0xb8] sm:$0xff] }
 0x1f9   :  { %4654 = vmatprep.subr.bf16.mxu1 %v2187_v33  ;;  %6567 = vmatmul.mubr.bf16.vlgmr.msra.gmra.mrb[0].mxu0 %v1336_v39  ;;  %v243_v33 = vld [vmem:[#allocation6 + $0xb8] sm:$0xff]  ;;  %v783_v34 = vcombine.high %v781_v29, %v781_v29  ;;  %v116_v35 = vmax.bf16 %v91_v32, %v65_v31  ;;  %v2218_v39 = vrot.slane %v2202_v15, %v7572_v5 }
 0x1fa   :  { %6575 = vmatpush1.bf16.xpose.msra.mxu0 %v2773_v40  ;;  %6606 = vmatprep.mubr.bf16.mxu0 %v1354_v41  ;;  %v2832_v36 = vrot.slane %v243_v33, %v7572_v5  ;;  %v797_v62 = vrot.slane %v781_v29, %v7572_v5 }
 0x1fb   :  { %6614 = vmatprep.subr.bf16.mxu0 %v2813_v44  ;;  %v811_v40 = vrot.slane %v783_v34, %v7572_v5  ;;  %v167_v41 = vmax.bf16 %v142_v37, %v116_v35  ;;  %v193_v44 = vld [vmem:[#allocation3 + $0x304] sm:$0xff] }
 0x1fc   :  { %v2840_v43 = vcombine.high %v2832_v36, %v2832_v36  ;;  %v813_v13 = vcombine.high %v797_v62, %v797_v62 }
 0x1fd   :  { %v815_v0 = vcombine.high %v811_v40, %v811_v40 }
 0x203   :  { %4647 = vmatmul.mubr.bf16.vlgmr.msra.gmra.mrb[0].mxu1 %v748_v52  ;;  %v218_v52 = vmax.bf16 %v193_v44, %v167_v41  ;;  %v92_v41 = vld [vmem:[#allocation3 + $0x184] sm:$0xf]  ;;  %v143_v44 = vld [vmem:[#allocation3 + $0x248] sm:$0xf] }
 0x204   :  { %4655 = vmatpush1.bf16.xpose.msra.mxu1 %v2185_v54  ;;  %4686 = vmatprep.mubr.bf16.mxu1 %v766_v55  ;;  %v104_v54 = vmax.bf16 %v79_v46, %v53_v45  ;;  %v2862_v55 = vrot.slane %v2840_v43, %v7572_v5  ;;  %v7033_v45 = vld.sshfl [vmem:[#allocation6 + $0xc0] sm:$0x33 pattern:$0x75316420] }
 0x205   :  { %4694 = vmatprep.subr.bf16.mxu1 %v2225_v58  ;;  %6607 = vmatmul.mubr.bf16.vlgmr.msra.gmra.mrb[0].mxu0 %v1352_v59  ;;  %v1411_v58 = vrot.slane %v218_v52, %v7572_v5  ;;  %v1404_v23 = vcombine.high %v218_v52, %v218_v52  ;;  %v2881_v52 = vcombine.high %v7033_v45, %v7033_v45 }
 0x206   :  { %6615 = vmatpush1.bf16.xpose.msra.mxu0 %v2799_v60  ;;  %6646 = vmatprep.mubr.bf16.mxu0 %v1392_v61  ;;  %v155_v59 = vmax.bf16 %v130_v57, %v104_v54  ;;  %v2252_v60 = vcombine.high %v2244_v56, %v2244_v56  ;;  %v181_v61 = vld [vmem:[#allocation3 + $0x2a4] sm:$0xff]  ;;  %v2872_v9 = vcombine.high %v2862_v55, %v2862_v55  ;;  %v194_v54 = vld [vmem:[#allocation3 + $0x30c] sm:$0xf] }
 0x207   :  { %6654 = vmatprep.subr.bf16.mxu0 %v2823_v63  ;;  %v2234_v63 = vcombine.high %v2218_v39, %v2218_v39  ;;  %v1419_v1 = vcombine.high %v1411_v58, %v1411_v58 }
 0x208   :  { %v206_v2 = vmax.bf16 %v181_v61, %v155_v59  ;;  %v2895_v59 = vrot.slane %v2881_v52, %v7572_v5 }
 0x20a   :  { %v823_v8 = vrot.slane %v206_v2, %v7572_v5 }
 0x20c   :  { %v839_v29 = vrot.slane %v823_v8, %v7572_v5 }
 0x20e   :  { %v861_v46 = vcombine.high %v839_v29, %v839_v29 }
 0x20f   :  { %4687 = vmatmul.mubr.bf16.vlgmr.msra.gmra.mrb[0].mxu1 %v764_v3  ;;  %v2274_v3 = vrot.slane %v2252_v60, %v7572_v5 }
 0x210   :  { %4695 = vmatpush1.bf16.xpose.msra.mxu1 %v2211_v4  ;;  %4726 = vmatprep.mubr.bf16.mxu1 %v804_v6  ;;  %v1401_v4 = vcombine.high %v1385_v48, %v1385_v48  ;;  %v2848_v6 = vrot.slane %v2832_v36, %v7572_v5 }
 0x211   :  { %4734 = vmatprep.subr.bf16.mxu1 %v2235_v7  ;;  %6647 = vmatmul.mubr.bf16.vlgmr.msra.gmra.mrb[0].mxu0 %v1378_v10  ;;  %v1441_v7 = vrot.slane %v1419_v1, %v7572_v5  ;;  %v2825_v10 = vcombine.high %v243_v33, %v243_v33  ;;  %v2284_v16 = vcombine.high %v2274_v3, %v2274_v3 }
 0x212   :  { %6655 = vmatpush1.bf16.xpose.msra.mxu0 %v2821_v11  ;;  %6686 = vmatprep.mubr.bf16.mxu0 %v1402_v12  ;;  %v831_v11 = vcombine.high %v823_v8, %v823_v8  ;;  %v816_v33 = vcombine.high %v206_v2, %v206_v2  ;;  %v2888_v2 = vrot.slane %v7033_v45, %v7572_v5 }
 0x213   :  { %6694 = vmatprep.subr.bf16.mxu0 %v2820_v14  ;;  %v2839_v12 = vrot.slane %v2825_v10, %v7572_v5  ;;  %v2260_v14 = vrot.slane %v2244_v56, %v7572_v5  ;;  %v1451_v22 = vcombine.high %v1441_v7, %v1441_v7  ;;  %v7032_v10 = vld [vmem:[%s7904_s2] ss:$0 sm:$0xff] }
 0x214   :  { %v853_v15 = vrot.slane %v831_v11, %v7572_v5  ;;  %v2896_v8 = vcombine.high %v2888_v2, %v2888_v2 }
 0x215   :  { %v2841_v17 = vcombine.high %v2839_v12, %v2839_v12  ;;  %v2855_v36 = vrot.slane %v2839_v12, %v7572_v5 }
 0x216   :  { %v863_v31 = vcombine.high %v853_v15, %v853_v15 }
 0x217   :  { %v2871_v56 = vcombine.high %v2855_v36, %v2855_v36 }
 0x21b   :  { %4727 = vmatmul.mubr.bf16.vlgmr.msra.gmra.mrb[0].mxu1 %v790_v18  ;;  %v2237_v18 = vcombine.high %v231_v47, %v231_v47 }
 0x21c   :  { %4735 = vmatpush1.bf16.xpose.msra.mxu1 %v2233_v19  ;;  %4766 = vmatprep.mubr.bf16.mxu1 %v814_v21  ;;  %v1427_v19 = vrot.slane %v1411_v58, %v7572_v5  ;;  %v2870_v21 = vcombine.high %v2848_v6, %v2848_v6 }
 0x21d   :  { %4774 = vmatprep.subr.bf16.mxu1 %v2232_v24  ;;  %6687 = vmatmul.mubr.bf16.vlgmr.msra.gmra.mrb[0].mxu0 %v1400_v25  ;;  %v2869_v24 = vrot.slane %v2841_v17, %v7572_v5  ;;  %v2251_v25 = vrot.slane %v2237_v18, %v7572_v5 }
 0x21e   :  { %6695 = vmatpush1.bf16.xpose.msra.mxu0 %v2806_v26  ;;  %6726 = vmatprep.mubr.bf16.mxu0 %v1399_v27  ;;  %v1418_v26 = vrot.slane %v1404_v23, %v7572_v5  ;;  %v1449_v35 = vcombine.high %v1427_v19, %v1427_v19 }
 0x21f   :  { %6734 = vmatprep.subr.bf16.mxu0 %v2824_v30  ;;  %v2253_v27 = vcombine.high %v2251_v25, %v2251_v25  ;;  %v2282_v30 = vcombine.high %v2260_v14, %v2260_v14  ;;  %v2267_v47 = vrot.slane %v2251_v25, %v7572_v5 }
 0x220   :  { %v1420_v32 = vcombine.high %v1418_v26, %v1418_v26 }
 0x221   :  { %v2281_v34 = vrot.slane %v2253_v27, %v7572_v5 }
 0x222   :  { %v1448_v37 = vrot.slane %v1420_v32, %v7572_v5 }
 0x224   :  { %v1452_v57 = vcombine.high %v1448_v37, %v1448_v37 }
 0x227   :  { %4767 = vmatmul.mubr.bf16.vlgmr.msra.gmra.mrb[0].mxu1 %v812_v38  ;;  %v830_v38 = vrot.slane %v816_v33, %v7572_v5 }
 0x228   :  { %4775 = vmatpush1.bf16.xpose.msra.mxu1 %v2218_v39  ;;  %4806 = vmatprep.mubr.bf16.mxu1 %v811_v40  ;;  %v2873_v39 = vcombine.high %v2869_v24, %v2869_v24  ;;  %v66_v40 = vld [vmem:[#allocation3 + $0xc0] sm:$0xf] }
 0x229   :  { %4814 = vmatprep.subr.bf16.mxu1 %v2236_v42  ;;  %6727 = vmatmul.mubr.bf16.vlgmr.msra.gmra.mrb[0].mxu0 %v1385_v48  ;;  %v832_v42 = vcombine.high %v830_v38, %v830_v38  ;;  %v117_v43 = vmax.bf16 %v92_v41, %v66_v40  ;;  %v846_v61 = vrot.slane %v830_v38, %v7572_v5 }
 0x22a   :  { %6735 = vmatpush1.bf16.xpose.msra.mxu0 %v2822_v50  ;;  %6766 = vmatprep.mubr.bf16.mxu0 %v1403_v51  ;;  %v2285_v51 = vcombine.high %v2281_v34, %v2281_v34 }
 0x22b   :  { %6774 = vmatprep.subr.bf16.mxu0 %v2862_v55  ;;  %v860_v48 = vrot.slane %v832_v42, %v7572_v5  ;;  %v168_v50 = vmax.bf16 %v143_v44, %v117_v43  ;;  %v1434_v55 = vrot.slane %v1418_v26, %v7572_v5 }
 0x22d   :  { %v219_v58 = vmax.bf16 %v194_v54, %v168_v50  ;;  %v1450_v1 = vcombine.high %v1434_v55, %v1434_v55 }
 0x22f   :  { %v1459_v60 = vrot.slane %v219_v58, %v7572_v5 }
 0x233   :  { %4807 = vmatmul.mubr.bf16.vlgmr.msra.gmra.mrb[0].mxu1 %v797_v62  ;;  %v2283_v62 = vcombine.high %v2267_v47, %v2267_v47 }
 0x234   :  { %4815 = vmatpush1.bf16.xpose.msra.mxu1 %v2234_v63  ;;  %4846 = vmatprep.mubr.bf16.mxu1 %v815_v0  ;;  %v864_v63 = vcombine.high %v860_v48, %v860_v48  ;;  %v1460_v0 = vcombine.high %v1459_v60, %v1459_v60 }
 0x235   :  { %4854 = vmatprep.subr.bf16.mxu1 %v2274_v3  ;;  %6767 = vmatmul.mubr.bf16.vlgmr.msra.gmra.mrb[0].mxu0 %v1401_v4  ;;  %v2897_v4 = vcombine.high %v2895_v59, %v2895_v59 }
 0x236   :  { %6775 = vmatpush1.bf16.xpose.msra.mxu0 %v2848_v6  ;;  %6806 = vmatprep.mubr.bf16.mxu0 %v1441_v7  ;;  %v1474_v3 = vrot.slane %v1460_v0, %v7572_v5  ;;  %v862_v6 = vcombine.high %v846_v61, %v846_v61  ;;  %v1467_v7 = vrot.slane %v1459_v60, %v7572_v5 }
 0x237   :  { %6814 = vmatprep.subr.bf16.mxu0 %v2872_v9 }
 0x238   :  { %v1476_v9 = vcombine.high %v1474_v3, %v1474_v3 }
 0x23f   :  { %4847 = vmatmul.mubr.bf16.vlgmr.msra.gmra.mrb[0].mxu1 %v813_v13 }
 0x240   :  { %4855 = vmatpush1.bf16.xpose.msra.mxu1 %v2260_v14  ;;  %4886 = vmatprep.mubr.bf16.mxu1 %v853_v15 }
 0x241   :  { %4894 = vmatprep.subr.bf16.mxu1 %v2284_v16  ;;  %6807 = vmatmul.mubr.bf16.vlgmr.msra.gmra.mrb[0].mxu0 %v1427_v19 }
 0x242   :  { %6815 = vmatpush1.bf16.xpose.msra.mxu0 %v2870_v21  ;;  %6846 = vmatprep.mubr.bf16.mxu0 %v1451_v22 }
 0x243   :  { %6854 = vmatprep.subr.bf16.mxu0 %v2869_v24 }
 0x24b   :  { %4887 = vmatmul.mubr.bf16.vlgmr.msra.gmra.mrb[0].mxu1 %v839_v29 }
 0x24c   :  { %4895 = vmatpush1.bf16.xpose.msra.mxu1 %v2282_v30  ;;  %4926 = vmatprep.mubr.bf16.mxu1 %v863_v31 }
 0x24d   :  { %4934 = vmatprep.subr.bf16.mxu1 %v2281_v34  ;;  %6847 = vmatmul.mubr.bf16.vlgmr.msra.gmra.mrb[0].mxu0 %v1449_v35 }
 0x24e   :  { %6855 = vmatpush1.bf16.xpose.msra.mxu0 %v2855_v36  ;;  %6886 = vmatprep.mubr.bf16.mxu0 %v1448_v37 }
 0x24f   :  { %6894 = vmatprep.subr.bf16.mxu0 %v2873_v39 }
 0x257   :  { %4927 = vmatmul.mubr.bf16.vlgmr.msra.gmra.mrb[0].mxu1 %v861_v46 }
 0x258   :  { %4935 = vmatpush1.bf16.xpose.msra.mxu1 %v2267_v47  ;;  %4966 = vmatprep.mubr.bf16.mxu1 %v860_v48 }
 0x259   :  { %4974 = vmatprep.subr.bf16.mxu1 %v2285_v51  ;;  %6887 = vmatmul.mubr.bf16.vlgmr.msra.gmra.mrb[0].mxu0 %v1434_v55 }
 0x25a   :  { %6895 = vmatpush1.bf16.xpose.msra.mxu0 %v2871_v56  ;;  %6926 = vmatprep.mubr.bf16.mxu0 %v1452_v57 }
 0x25b   :  { %6934 = vmatprep.subr.bf16.mxu0 %v2895_v59 }
 0x263   :  { %4967 = vmatmul.mubr.bf16.vlgmr.msra.gmra.mrb[0].mxu1 %v846_v61 }
 0x264   :  { %4975 = vmatpush1.bf16.xpose.msra.mxu1 %v2283_v62  ;;  %5006 = vmatprep.mubr.bf16.mxu1 %v864_v63 }
 0x265   :  { %5014 = vmatprep.subr.bf16.mxu1 %v7583_v28  ;;  %6927 = vmatmul.mubr.bf16.vlgmr.msra.gmra.mrb[0].mxu0 %v1450_v1  ;;  %v1475_v28 = vcombine.high %v1467_v7, %v1467_v7 }
 0x266   :  { %6935 = vmatpush1.bf16.xpose.msra.mxu0 %v2888_v2  ;;  %6966 = vmatprep.mubr.bf16.mxu0 %v1474_v3 }
 0x267   :  { %6974 = vmatprep.subr.bf16.mxu0 %v2897_v4 }
 0x26f   :  { %5007 = vmatmul.mubr.bf16.vlgmr.msra.gmra.mrb[0].mxu1 %v862_v6 }
 0x270   :  { %5015 = vmatpush1.bf16.xpose.msra.mxu1 %v7577_v20  ;;  %5046 = vmatprep.mubr.bf16.mxu1 %v7601_v53 }
 0x271   :  { %6967 = vmatmul.mubr.bf16.vlgmr.msra.gmra.mrb[0].mxu0 %v1467_v7 }
 0x272   :  { %6975 = vmatpush1.bf16.xpose.msra.mxu0 %v2896_v8  ;;  %7006 = vmatprep.mubr.bf16.mxu0 %v1476_v9 }
 0x27b   :  { %5047 = vmatmul.mubr.bf16.vlgmr.msra.gmra.mrb[0].mxu1 %v7596_v49 }
 0x27d   :  { %7007 = vmatmul.mubr.bf16.vlgmr.msra.gmra.mrb[0].mxu0 %v1475_v28 }
 0x34e   :  { %v5048_v11 = vpop.f32.mrb[0].mxu1 }
 0x34f   :  { %v7034_v12 = vadd.f32 %v7032_v10, %v5048_v11  ;;  %v5050_v5 = vpop.f32.mrb[1].mxu1 }
 0x350   :  { %v5051_v13 = vpop.f32.mrb[2].mxu1  ;;  %v7008_v53 = vpop.f32.mrb[0].mxu0 }
 0x351   :  { %v5052_v20 = vpop.f32.mrb[3].mxu1  ;;  %v7035_v14 = vadd.f32 %v7034_v12, %v7008_v53  ;;  %v7010_v15 = vpop.f32.mrb[1].mxu0 }
 0x352   :  { %v7011_v16 = vpop.f32.mrb[2].mxu0 }
 0x353   :  { %v7012_v49 = vpop.f32.mrb[3].mxu0  ;;  %7015 = vst.msk [vmem:[#allocation8] sm:$0x3] %vm7014_vm0, %v7035_v14 }
 0x354   :  { %7505 = shalt.err (!%p7502_p6)
}
 0x355   :  { %s7506_s15 = scalar_lea.hbm %s7905_s3, 32 }
 0x356   :  { %p7507_p7 = scmp.ne.s32.totalorder %s7905_s3, %s7506_s15  ;;  %p7510_p8 = scmp.lt.u32.totalorder %s7506_s15, %s7905_s3 }
 0x358   :  { %p7512_p9 = pnand %p7510_p8, %p7507_p7 }
 0x35a   :  { %7515 = shalt.err (!%p7512_p9)
}
 0x35b   :  { %7025 = dma.vmem_to_hbm [thread:$0]  %s7023_s12, 32, %s7905_s3, [#allocation5]  }
 0x35c   :  { %7520 = dma.done.wait [#allocation5], 32  }
 0x35d   :  { %7521 = vsyncadd [#allocation5], 4294967264 }
 0x35e   :  { %7029 = vsyncpa [#allocation4], 1 }
 0x35f   :  { %7030 = vsyncpa [#allocation7], 1 }
 0x360   :  { %7031 = vsyncpa [#allocation5], 1 }

</bundles_post_ra>
